<compile_context>
chip_gen: v7x
topology: tpu7x:2x2x1
jax: 0.10.0
libtpu: 0.0.40
codegen_flags: <defaults>
</compile_context>

<pallas_src>
import functools

import jax
import jax.numpy as jnp
from jax.experimental import pallas as pl
from jax.experimental.pallas import tpu as pltpu

_LANES = 128
_SUBLANES = 8
_TILE = _LANES * _SUBLANES          # 1024: pad target -> fully dense (8,128) tiles
# Single-block design: live set in-kernel is ~(input + output + bits) = 3 copies.
# Stay well inside the 32 MiB scoped VMEM limit we request below (safe on v5e/v6e/v7x).
_VMEM_LIMIT_BYTES = 32 * 1024 * 1024
_MAX_SINGLE_BLOCK_BYTES = 8 * 1024 * 1024   # per-copy cap (~2M f32 elements)


def _topk_mask_kernel(x_ref, o_ref, *, k):
    x = x_ref[...]
    # |x| as int32 bit pattern: for non-negative floats the int32 ordering is
    # identical to the float ordering, so we can threshold on bits exactly.
    bits = pltpu.bitcast(jnp.abs(x), jnp.int32)

    # Bitwise binary search (MSB -> LSB) for the largest threshold t such that
    # count(bits >= t) >= k.  That t is exactly the k-th largest |x| pattern.
    # Bit 31 (sign) is always 0 for |x|, so 31 exact passes; fully unrolled so
    # the LLO scheduler sees the whole dependence chain.
    thr = jnp.int32(0)
    for b in range(30, -1, -1):
        cand = thr | jnp.int32(1 << b)
        # Keep the count in vregs: compare -> bool->i32 cast -> reduce
        # (sublane adds on the VPU, one cross-lane XLU reduce).  No full-size
        # int32 temp stored to VMEM.
        cnt = jnp.sum((bits >= cand).astype(jnp.int32))
        thr = jnp.where(cnt >= k, cand, thr)

    # Single VPU select instead of cast + multiply.
    o_ref[...] = jnp.where(bits >= thr, x, 0.0).astype(o_ref.dtype)


def _reference(x, compression_ratio):
    """Pure-JAX reference with the same semantics (verification + fallback)."""
    n = x.size
    k = max(1, int(n * compression_ratio))
    absf = jnp.abs(x).reshape(-1).astype(jnp.float32)
    thr = jnp.sort(absf)[n - k]
    mask = (absf >= thr).astype(x.dtype)
    return (x.reshape(-1) * mask).reshape(x.shape)


def topk_compress(x, compression_ratio):
    """Pallas implementation of TopKCompressor.forward."""
    n = x.size
    k = max(1, int(n * compression_ratio))   # static, exactly like the PyTorch code

    orig_dtype = x.dtype
    if orig_dtype == jnp.float32:
        xf = x
    elif orig_dtype in (jnp.bfloat16, jnp.float16):
        # Exact: f32 is a superset of bf16/f16, and abs-thresholding is
        # monotone under the (injective) upcast.
        xf = x.astype(jnp.float32)
    else:
        # TODO(synk): integer / f64 inputs use the exact JAX fallback for now.
        return _reference(x, compression_ratio)

    pad = (-n) % _TILE
    padded = n + pad
    if padded * 4 > _MAX_SINGLE_BLOCK_BYTES:
        # TODO(synk): chunked / sampled-threshold variant for VMEM-oversized tensors.
        return _reference(x, compression_ratio)

    flat = jnp.reshape(xf, (-1,))
    if pad:
        # Rare path (numel not a multiple of 1024).  Padded zeros have |.| = 0
        # and never displace real top-k elements, so no in-kernel masking needed.
        flat = jnp.concatenate([flat, jnp.zeros((pad,), dtype=jnp.float32)])
    rows = padded // _LANES            # rows % 8 == 0 -> fully dense (8,128) tiles
    # When pad == 0 this reshape is a contiguous bitcast -> no extra HBM pass.
    x2 = flat.reshape(rows, _LANES)

    kernel = functools.partial(_topk_mask_kernel, k=k)
    out2 = pl.pallas_call(
        kernel,
        out_shape=jax.ShapeDtypeStruct((rows, _LANES), jnp.float32),
        # Whole array resident in VMEM, no grid -> no pipeline double-buffering.
        in_specs=[pl.BlockSpec(memory_space=pltpu.MemorySpace.VMEM)],
        out_specs=pl.BlockSpec(memory_space=pltpu.MemorySpace.VMEM),
        compiler_params=pltpu.CompilerParams(
            vmem_limit_bytes=_VMEM_LIMIT_BYTES),
        cost_estimate=pl.CostEstimate(
            flops=32 * 3 * padded, transcendentals=0, bytes_accessed=8 * padded),
    )(x2)

    out_flat = out2.reshape(-1)
    if pad:
        out_flat = out_flat[:n]
    out = out_flat.reshape(x.shape)
    if orig_dtype != jnp.float32:
        out = out.astype(orig_dtype)
    return out


if __name__ == "__main__":
    key = jax.random.PRNGKey(0)
    x = jax.random.normal(key, (2, 4, 16, 16), dtype=jnp.float32)
    compression_ratio = 0.1   # k = max(1, int(2048 * 0.1)) = 204

    out = topk_compress(x, compression_ratio)
    out = jax.block_until_ready(out)

    ref = _reference(x, compression_ratio)
    assert out.shape == x.shape and out.dtype == x.dtype
    assert jnp.allclose(out, ref), "Pallas output mismatch vs reference"
    # sanity: exactly k nonzeros survive (no ties with continuous inputs)
    k = max(1, int(x.size * compression_ratio))
    assert int(jnp.sum(out != 0)) == k

    print("KERNEL_OK")
</pallas_src>

<mosaic_0001>
module attributes {stable_mosaic.version = 11 : i64} {
  func.func @_topk_mask_kernel(%arg0: memref<16x128xf32, #tpu.memory_space<vmem>>, %arg1: memref<16x128xf32, #tpu.memory_space<vmem>>) attributes {dimension_semantics = [], scalar_prefetch = 0 : i64, scratch_operands = 0 : i64, tpu.core_type = #tpu.core_type<tc>} {
    %c0 = arith.constant 0 : index
    %c0_0 = arith.constant 0 : index
    %0 = vector.load %arg0[%c0, %c0_0] : memref<16x128xf32, #tpu.memory_space<vmem>>, vector<16x128xf32>
    %1 = math.absf %0 : vector<16x128xf32>
    %2 = tpu.bitcast %1 : vector<16x128xf32> -> vector<16x128xi32>
    %c0_i32 = arith.constant 0 : i32
    %c1073741824_i32 = arith.constant 1073741824 : i32
    %3 = arith.ori %c0_i32, %c1073741824_i32 : i32
    %4 = vector.broadcast %3 : i32 to vector<16x128xi32>
    %5 = arith.cmpi sge, %2, %4 : vector<16x128xi32>
    %6 = arith.extui %5 : vector<16x128xi1> to vector<16x128xi32>
    %7 = vector.shape_cast %6 : vector<16x128xi32> to vector<1x16x128xi32>
    %cst = arith.constant dense<0> : vector<1xi32>
    %8 = vector.multi_reduction <add>, %7, %cst [1, 2] : vector<1x16x128xi32> to vector<1xi32>
    %9 = vector.shape_cast %8 : vector<1xi32> to vector<1x1x1xi32>
    %10 = vector.extract %9[0, 0, 0] : i32 from vector<1x1x1xi32>
    %c204_i32 = arith.constant 204 : i32
    %11 = arith.cmpi sge, %10, %c204_i32 : i32
    %c0_i32_1 = arith.constant 0 : i32
    %12 = arith.select %11, %3, %c0_i32_1 : i32
    %c536870912_i32 = arith.constant 536870912 : i32
    %13 = arith.ori %12, %c536870912_i32 : i32
    %14 = vector.broadcast %13 : i32 to vector<16x128xi32>
    %15 = arith.cmpi sge, %2, %14 : vector<16x128xi32>
    %16 = arith.extui %15 : vector<16x128xi1> to vector<16x128xi32>
    %17 = vector.shape_cast %16 : vector<16x128xi32> to vector<1x16x128xi32>
    %cst_2 = arith.constant dense<0> : vector<1xi32>
    %18 = vector.multi_reduction <add>, %17, %cst_2 [1, 2] : vector<1x16x128xi32> to vector<1xi32>
    %19 = vector.shape_cast %18 : vector<1xi32> to vector<1x1x1xi32>
    %20 = vector.extract %19[0, 0, 0] : i32 from vector<1x1x1xi32>
    %c204_i32_3 = arith.constant 204 : i32
    %21 = arith.cmpi sge, %20, %c204_i32_3 : i32
    %22 = arith.select %21, %13, %12 : i32
    %c268435456_i32 = arith.constant 268435456 : i32
    %23 = arith.ori %22, %c268435456_i32 : i32
    %24 = vector.broadcast %23 : i32 to vector<16x128xi32>
    %25 = arith.cmpi sge, %2, %24 : vector<16x128xi32>
    %26 = arith.extui %25 : vector<16x128xi1> to vector<16x128xi32>
    %27 = vector.shape_cast %26 : vector<16x128xi32> to vector<1x16x128xi32>
    %cst_4 = arith.constant dense<0> : vector<1xi32>
    %28 = vector.multi_reduction <add>, %27, %cst_4 [1, 2] : vector<1x16x128xi32> to vector<1xi32>
    %29 = vector.shape_cast %28 : vector<1xi32> to vector<1x1x1xi32>
    %30 = vector.extract %29[0, 0, 0] : i32 from vector<1x1x1xi32>
    %c204_i32_5 = arith.constant 204 : i32
    %31 = arith.cmpi sge, %30, %c204_i32_5 : i32
    %32 = arith.select %31, %23, %22 : i32
    %c134217728_i32 = arith.constant 134217728 : i32
    %33 = arith.ori %32, %c134217728_i32 : i32
    %34 = vector.broadcast %33 : i32 to vector<16x128xi32>
    %35 = arith.cmpi sge, %2, %34 : vector<16x128xi32>
    %36 = arith.extui %35 : vector<16x128xi1> to vector<16x128xi32>
    %37 = vector.shape_cast %36 : vector<16x128xi32> to vector<1x16x128xi32>
    %cst_6 = arith.constant dense<0> : vector<1xi32>
    %38 = vector.multi_reduction <add>, %37, %cst_6 [1, 2] : vector<1x16x128xi32> to vector<1xi32>
    %39 = vector.shape_cast %38 : vector<1xi32> to vector<1x1x1xi32>
    %40 = vector.extract %39[0, 0, 0] : i32 from vector<1x1x1xi32>
    %c204_i32_7 = arith.constant 204 : i32
    %41 = arith.cmpi sge, %40, %c204_i32_7 : i32
    %42 = arith.select %41, %33, %32 : i32
    %c67108864_i32 = arith.constant 67108864 : i32
    %43 = arith.ori %42, %c67108864_i32 : i32
    %44 = vector.broadcast %43 : i32 to vector<16x128xi32>
    %45 = arith.cmpi sge, %2, %44 : vector<16x128xi32>
    %46 = arith.extui %45 : vector<16x128xi1> to vector<16x128xi32>
    %47 = vector.shape_cast %46 : vector<16x128xi32> to vector<1x16x128xi32>
    %cst_8 = arith.constant dense<0> : vector<1xi32>
    %48 = vector.multi_reduction <add>, %47, %cst_8 [1, 2] : vector<1x16x128xi32> to vector<1xi32>
    %49 = vector.shape_cast %48 : vector<1xi32> to vector<1x1x1xi32>
    %50 = vector.extract %49[0, 0, 0] : i32 from vector<1x1x1xi32>
    %c204_i32_9 = arith.constant 204 : i32
    %51 = arith.cmpi sge, %50, %c204_i32_9 : i32
    %52 = arith.select %51, %43, %42 : i32
    %c33554432_i32 = arith.constant 33554432 : i32
    %53 = arith.ori %52, %c33554432_i32 : i32
    %54 = vector.broadcast %53 : i32 to vector<16x128xi32>
    %55 = arith.cmpi sge, %2, %54 : vector<16x128xi32>
    %56 = arith.extui %55 : vector<16x128xi1> to vector<16x128xi32>
    %57 = vector.shape_cast %56 : vector<16x128xi32> to vector<1x16x128xi32>
    %cst_10 = arith.constant dense<0> : vector<1xi32>
    %58 = vector.multi_reduction <add>, %57, %cst_10 [1, 2] : vector<1x16x128xi32> to vector<1xi32>
    %59 = vector.shape_cast %58 : vector<1xi32> to vector<1x1x1xi32>
    %60 = vector.extract %59[0, 0, 0] : i32 from vector<1x1x1xi32>
    %c204_i32_11 = arith.constant 204 : i32
    %61 = arith.cmpi sge, %60, %c204_i32_11 : i32
    %62 = arith.select %61, %53, %52 : i32
    %c16777216_i32 = arith.constant 16777216 : i32
    %63 = arith.ori %62, %c16777216_i32 : i32
    %64 = vector.broadcast %63 : i32 to vector<16x128xi32>
    %65 = arith.cmpi sge, %2, %64 : vector<16x128xi32>
    %66 = arith.extui %65 : vector<16x128xi1> to vector<16x128xi32>
    %67 = vector.shape_cast %66 : vector<16x128xi32> to vector<1x16x128xi32>
    %cst_12 = arith.constant dense<0> : vector<1xi32>
    %68 = vector.multi_reduction <add>, %67, %cst_12 [1, 2] : vector<1x16x128xi32> to vector<1xi32>
    %69 = vector.shape_cast %68 : vector<1xi32> to vector<1x1x1xi32>
    %70 = vector.extract %69[0, 0, 0] : i32 from vector<1x1x1xi32>
    %c204_i32_13 = arith.constant 204 : i32
    %71 = arith.cmpi sge, %70, %c204_i32_13 : i32
    %72 = arith.select %71, %63, %62 : i32
    %c8388608_i32 = arith.constant 8388608 : i32
    %73 = arith.ori %72, %c8388608_i32 : i32
    %74 = vector.broadcast %73 : i32 to vector<16x128xi32>
    %75 = arith.cmpi sge, %2, %74 : vector<16x128xi32>
    %76 = arith.extui %75 : vector<16x128xi1> to vector<16x128xi32>
    %77 = vector.shape_cast %76 : vector<16x128xi32> to vector<1x16x128xi32>
    %cst_14 = arith.constant dense<0> : vector<1xi32>
    %78 = vector.multi_reduction <add>, %77, %cst_14 [1, 2] : vector<1x16x128xi32> to vector<1xi32>
    %79 = vector.shape_cast %78 : vector<1xi32> to vector<1x1x1xi32>
    %80 = vector.extract %79[0, 0, 0] : i32 from vector<1x1x1xi32>
    %c204_i32_15 = arith.constant 204 : i32
    %81 = arith.cmpi sge, %80, %c204_i32_15 : i32
    %82 = arith.select %81, %73, %72 : i32
    %c4194304_i32 = arith.constant 4194304 : i32
    %83 = arith.ori %82, %c4194304_i32 : i32
    %84 = vector.broadcast %83 : i32 to vector<16x128xi32>
    %85 = arith.cmpi sge, %2, %84 : vector<16x128xi32>
    %86 = arith.extui %85 : vector<16x128xi1> to vector<16x128xi32>
    %87 = vector.shape_cast %86 : vector<16x128xi32> to vector<1x16x128xi32>
    %cst_16 = arith.constant dense<0> : vector<1xi32>
    %88 = vector.multi_reduction <add>, %87, %cst_16 [1, 2] : vector<1x16x128xi32> to vector<1xi32>
    %89 = vector.shape_cast %88 : vector<1xi32> to vector<1x1x1xi32>
    %90 = vector.extract %89[0, 0, 0] : i32 from vector<1x1x1xi32>
    %c204_i32_17 = arith.constant 204 : i32
    %91 = arith.cmpi sge, %90, %c204_i32_17 : i32
    %92 = arith.select %91, %83, %82 : i32
    %c2097152_i32 = arith.constant 2097152 : i32
    %93 = arith.ori %92, %c2097152_i32 : i32
    %94 = vector.broadcast %93 : i32 to vector<16x128xi32>
    %95 = arith.cmpi sge, %2, %94 : vector<16x128xi32>
    %96 = arith.extui %95 : vector<16x128xi1> to vector<16x128xi32>
    %97 = vector.shape_cast %96 : vector<16x128xi32> to vector<1x16x128xi32>
    %cst_18 = arith.constant dense<0> : vector<1xi32>
    %98 = vector.multi_reduction <add>, %97, %cst_18 [1, 2] : vector<1x16x128xi32> to vector<1xi32>
    %99 = vector.shape_cast %98 : vector<1xi32> to vector<1x1x1xi32>
    %100 = vector.extract %99[0, 0, 0] : i32 from vector<1x1x1xi32>
    %c204_i32_19 = arith.constant 204 : i32
    %101 = arith.cmpi sge, %100, %c204_i32_19 : i32
    %102 = arith.select %101, %93, %92 : i32
    %c1048576_i32 = arith.constant 1048576 : i32
    %103 = arith.ori %102, %c1048576_i32 : i32
    %104 = vector.broadcast %103 : i32 to vector<16x128xi32>
    %105 = arith.cmpi sge, %2, %104 : vector<16x128xi32>
    %106 = arith.extui %105 : vector<16x128xi1> to vector<16x128xi32>
    %107 = vector.shape_cast %106 : vector<16x128xi32> to vector<1x16x128xi32>
    %cst_20 = arith.constant dense<0> : vector<1xi32>
    %108 = vector.multi_reduction <add>, %107, %cst_20 [1, 2] : vector<1x16x128xi32> to vector<1xi32>
    %109 = vector.shape_cast %108 : vector<1xi32> to vector<1x1x1xi32>
    %110 = vector.extract %109[0, 0, 0] : i32 from vector<1x1x1xi32>
    %c204_i32_21 = arith.constant 204 : i32
    %111 = arith.cmpi sge, %110, %c204_i32_21 : i32
    %112 = arith.select %111, %103, %102 : i32
    %c524288_i32 = arith.constant 524288 : i32
    %113 = arith.ori %112, %c524288_i32 : i32
    %114 = vector.broadcast %113 : i32 to vector<16x128xi32>
    %115 = arith.cmpi sge, %2, %114 : vector<16x128xi32>
    %116 = arith.extui %115 : vector<16x128xi1> to vector<16x128xi32>
    %117 = vector.shape_cast %116 : vector<16x128xi32> to vector<1x16x128xi32>
    %cst_22 = arith.constant dense<0> : vector<1xi32>
    %118 = vector.multi_reduction <add>, %117, %cst_22 [1, 2] : vector<1x16x128xi32> to vector<1xi32>
    %119 = vector.shape_cast %118 : vector<1xi32> to vector<1x1x1xi32>
    %120 = vector.extract %119[0, 0, 0] : i32 from vector<1x1x1xi32>
    %c204_i32_23 = arith.constant 204 : i32
    %121 = arith.cmpi sge, %120, %c204_i32_23 : i32
    %122 = arith.select %121, %113, %112 : i32
    %c262144_i32 = arith.constant 262144 : i32
    %123 = arith.ori %122, %c262144_i32 : i32
    %124 = vector.broadcast %123 : i32 to vector<16x128xi32>
    %125 = arith.cmpi sge, %2, %124 : vector<16x128xi32>
    %126 = arith.extui %125 : vector<16x128xi1> to vector<16x128xi32>
    %127 = vector.shape_cast %126 : vector<16x128xi32> to vector<1x16x128xi32>
    %cst_24 = arith.constant dense<0> : vector<1xi32>
    %128 = vector.multi_reduction <add>, %127, %cst_24 [1, 2] : vector<1x16x128xi32> to vector<1xi32>
    %129 = vector.shape_cast %128 : vector<1xi32> to vector<1x1x1xi32>
    %130 = vector.extract %129[0, 0, 0] : i32 from vector<1x1x1xi32>
    %c204_i32_25 = arith.constant 204 : i32
    %131 = arith.cmpi sge, %130, %c204_i32_25 : i32
    %132 = arith.select %131, %123, %122 : i32
    %c131072_i32 = arith.constant 131072 : i32
    %133 = arith.ori %132, %c131072_i32 : i32
    %134 = vector.broadcast %133 : i32 to vector<16x128xi32>
    %135 = arith.cmpi sge, %2, %134 : vector<16x128xi32>
    %136 = arith.extui %135 : vector<16x128xi1> to vector<16x128xi32>
    %137 = vector.shape_cast %136 : vector<16x128xi32> to vector<1x16x128xi32>
    %cst_26 = arith.constant dense<0> : vector<1xi32>
    %138 = vector.multi_reduction <add>, %137, %cst_26 [1, 2] : vector<1x16x128xi32> to vector<1xi32>
    %139 = vector.shape_cast %138 : vector<1xi32> to vector<1x1x1xi32>
    %140 = vector.extract %139[0, 0, 0] : i32 from vector<1x1x1xi32>
    %c204_i32_27 = arith.constant 204 : i32
    %141 = arith.cmpi sge, %140, %c204_i32_27 : i32
    %142 = arith.select %141, %133, %132 : i32
    %c65536_i32 = arith.constant 65536 : i32
    %143 = arith.ori %142, %c65536_i32 : i32
    %144 = vector.broadcast %143 : i32 to vector<16x128xi32>
    %145 = arith.cmpi sge, %2, %144 : vector<16x128xi32>
    %146 = arith.extui %145 : vector<16x128xi1> to vector<16x128xi32>
    %147 = vector.shape_cast %146 : vector<16x128xi32> to vector<1x16x128xi32>
    %cst_28 = arith.constant dense<0> : vector<1xi32>
    %148 = vector.multi_reduction <add>, %147, %cst_28 [1, 2] : vector<1x16x128xi32> to vector<1xi32>
    %149 = vector.shape_cast %148 : vector<1xi32> to vector<1x1x1xi32>
    %150 = vector.extract %149[0, 0, 0] : i32 from vector<1x1x1xi32>
    %c204_i32_29 = arith.constant 204 : i32
    %151 = arith.cmpi sge, %150, %c204_i32_29 : i32
    %152 = arith.select %151, %143, %142 : i32
    %c32768_i32 = arith.constant 32768 : i32
    %153 = arith.ori %152, %c32768_i32 : i32
    %154 = vector.broadcast %153 : i32 to vector<16x128xi32>
    %155 = arith.cmpi sge, %2, %154 : vector<16x128xi32>
    %156 = arith.extui %155 : vector<16x128xi1> to vector<16x128xi32>
    %157 = vector.shape_cast %156 : vector<16x128xi32> to vector<1x16x128xi32>
    %cst_30 = arith.constant dense<0> : vector<1xi32>
    %158 = vector.multi_reduction <add>, %157, %cst_30 [1, 2] : vector<1x16x128xi32> to vector<1xi32>
    %159 = vector.shape_cast %158 : vector<1xi32> to vector<1x1x1xi32>
    %160 = vector.extract %159[0, 0, 0] : i32 from vector<1x1x1xi32>
    %c204_i32_31 = arith.constant 204 : i32
    %161 = arith.cmpi sge, %160, %c204_i32_31 : i32
    %162 = arith.select %161, %153, %152 : i32
    %c16384_i32 = arith.constant 16384 : i32
    %163 = arith.ori %162, %c16384_i32 : i32
    %164 = vector.broadcast %163 : i32 to vector<16x128xi32>
    %165 = arith.cmpi sge, %2, %164 : vector<16x128xi32>
    %166 = arith.extui %165 : vector<16x128xi1> to vector<16x128xi32>
    %167 = vector.shape_cast %166 : vector<16x128xi32> to vector<1x16x128xi32>
    %cst_32 = arith.constant dense<0> : vector<1xi32>
    %168 = vector.multi_reduction <add>, %167, %cst_32 [1, 2] : vector<1x16x128xi32> to vector<1xi32>
    %169 = vector.shape_cast %168 : vector<1xi32> to vector<1x1x1xi32>
    %170 = vector.extract %169[0, 0, 0] : i32 from vector<1x1x1xi32>
    %c204_i32_33 = arith.constant 204 : i32
    %171 = arith.cmpi sge, %170, %c204_i32_33 : i32
    %172 = arith.select %171, %163, %162 : i32
    %c8192_i32 = arith.constant 8192 : i32
    %173 = arith.ori %172, %c8192_i32 : i32
    %174 = vector.broadcast %173 : i32 to vector<16x128xi32>
    %175 = arith.cmpi sge, %2, %174 : vector<16x128xi32>
    %176 = arith.extui %175 : vector<16x128xi1> to vector<16x128xi32>
    %177 = vector.shape_cast %176 : vector<16x128xi32> to vector<1x16x128xi32>
    %cst_34 = arith.constant dense<0> : vector<1xi32>
    %178 = vector.multi_reduction <add>, %177, %cst_34 [1, 2] : vector<1x16x128xi32> to vector<1xi32>
    %179 = vector.shape_cast %178 : vector<1xi32> to vector<1x1x1xi32>
    %180 = vector.extract %179[0, 0, 0] : i32 from vector<1x1x1xi32>
    %c204_i32_35 = arith.constant 204 : i32
    %181 = arith.cmpi sge, %180, %c204_i32_35 : i32
    %182 = arith.select %181, %173, %172 : i32
    %c4096_i32 = arith.constant 4096 : i32
    %183 = arith.ori %182, %c4096_i32 : i32
    %184 = vector.broadcast %183 : i32 to vector<16x128xi32>
    %185 = arith.cmpi sge, %2, %184 : vector<16x128xi32>
    %186 = arith.extui %185 : vector<16x128xi1> to vector<16x128xi32>
    %187 = vector.shape_cast %186 : vector<16x128xi32> to vector<1x16x128xi32>
    %cst_36 = arith.constant dense<0> : vector<1xi32>
    %188 = vector.multi_reduction <add>, %187, %cst_36 [1, 2] : vector<1x16x128xi32> to vector<1xi32>
    %189 = vector.shape_cast %188 : vector<1xi32> to vector<1x1x1xi32>
    %190 = vector.extract %189[0, 0, 0] : i32 from vector<1x1x1xi32>
    %c204_i32_37 = arith.constant 204 : i32
    %191 = arith.cmpi sge, %190, %c204_i32_37 : i32
    %192 = arith.select %191, %183, %182 : i32
    %c2048_i32 = arith.constant 2048 : i32
    %193 = arith.ori %192, %c2048_i32 : i32
    %194 = vector.broadcast %193 : i32 to vector<16x128xi32>
    %195 = arith.cmpi sge, %2, %194 : vector<16x128xi32>
    %196 = arith.extui %195 : vector<16x128xi1> to vector<16x128xi32>
    %197 = vector.shape_cast %196 : vector<16x128xi32> to vector<1x16x128xi32>
    %cst_38 = arith.constant dense<0> : vector<1xi32>
    %198 = vector.multi_reduction <add>, %197, %cst_38 [1, 2] : vector<1x16x128xi32> to vector<1xi32>
    %199 = vector.shape_cast %198 : vector<1xi32> to vector<1x1x1xi32>
    %200 = vector.extract %199[0, 0, 0] : i32 from vector<1x1x1xi32>
    %c204_i32_39 = arith.constant 204 : i32
    %201 = arith.cmpi sge, %200, %c204_i32_39 : i32
    %202 = arith.select %201, %193, %192 : i32
    %c1024_i32 = arith.constant 1024 : i32
    %203 = arith.ori %202, %c1024_i32 : i32
    %204 = vector.broadcast %203 : i32 to vector<16x128xi32>
    %205 = arith.cmpi sge, %2, %204 : vector<16x128xi32>
    %206 = arith.extui %205 : vector<16x128xi1> to vector<16x128xi32>
    %207 = vector.shape_cast %206 : vector<16x128xi32> to vector<1x16x128xi32>
    %cst_40 = arith.constant dense<0> : vector<1xi32>
    %208 = vector.multi_reduction <add>, %207, %cst_40 [1, 2] : vector<1x16x128xi32> to vector<1xi32>
    %209 = vector.shape_cast %208 : vector<1xi32> to vector<1x1x1xi32>
    %210 = vector.extract %209[0, 0, 0] : i32 from vector<1x1x1xi32>
    %c204_i32_41 = arith.constant 204 : i32
    %211 = arith.cmpi sge, %210, %c204_i32_41 : i32
    %212 = arith.select %211, %203, %202 : i32
    %c512_i32 = arith.constant 512 : i32
    %213 = arith.ori %212, %c512_i32 : i32
    %214 = vector.broadcast %213 : i32 to vector<16x128xi32>
    %215 = arith.cmpi sge, %2, %214 : vector<16x128xi32>
    %216 = arith.extui %215 : vector<16x128xi1> to vector<16x128xi32>
    %217 = vector.shape_cast %216 : vector<16x128xi32> to vector<1x16x128xi32>
    %cst_42 = arith.constant dense<0> : vector<1xi32>
    %218 = vector.multi_reduction <add>, %217, %cst_42 [1, 2] : vector<1x16x128xi32> to vector<1xi32>
    %219 = vector.shape_cast %218 : vector<1xi32> to vector<1x1x1xi32>
    %220 = vector.extract %219[0, 0, 0] : i32 from vector<1x1x1xi32>
    %c204_i32_43 = arith.constant 204 : i32
    %221 = arith.cmpi sge, %220, %c204_i32_43 : i32
    %222 = arith.select %221, %213, %212 : i32
    %c256_i32 = arith.constant 256 : i32
    %223 = arith.ori %222, %c256_i32 : i32
    %224 = vector.broadcast %223 : i32 to vector<16x128xi32>
    %225 = arith.cmpi sge, %2, %224 : vector<16x128xi32>
    %226 = arith.extui %225 : vector<16x128xi1> to vector<16x128xi32>
    %227 = vector.shape_cast %226 : vector<16x128xi32> to vector<1x16x128xi32>
    %cst_44 = arith.constant dense<0> : vector<1xi32>
    %228 = vector.multi_reduction <add>, %227, %cst_44 [1, 2] : vector<1x16x128xi32> to vector<1xi32>
    %229 = vector.shape_cast %228 : vector<1xi32> to vector<1x1x1xi32>
    %230 = vector.extract %229[0, 0, 0] : i32 from vector<1x1x1xi32>
    %c204_i32_45 = arith.constant 204 : i32
    %231 = arith.cmpi sge, %230, %c204_i32_45 : i32
    %232 = arith.select %231, %223, %222 : i32
    %c128_i32 = arith.constant 128 : i32
    %233 = arith.ori %232, %c128_i32 : i32
    %234 = vector.broadcast %233 : i32 to vector<16x128xi32>
    %235 = arith.cmpi sge, %2, %234 : vector<16x128xi32>
    %236 = arith.extui %235 : vector<16x128xi1> to vector<16x128xi32>
    %237 = vector.shape_cast %236 : vector<16x128xi32> to vector<1x16x128xi32>
    %cst_46 = arith.constant dense<0> : vector<1xi32>
    %238 = vector.multi_reduction <add>, %237, %cst_46 [1, 2] : vector<1x16x128xi32> to vector<1xi32>
    %239 = vector.shape_cast %238 : vector<1xi32> to vector<1x1x1xi32>
    %240 = vector.extract %239[0, 0, 0] : i32 from vector<1x1x1xi32>
    %c204_i32_47 = arith.constant 204 : i32
    %241 = arith.cmpi sge, %240, %c204_i32_47 : i32
    %242 = arith.select %241, %233, %232 : i32
    %c64_i32 = arith.constant 64 : i32
    %243 = arith.ori %242, %c64_i32 : i32
    %244 = vector.broadcast %243 : i32 to vector<16x128xi32>
    %245 = arith.cmpi sge, %2, %244 : vector<16x128xi32>
    %246 = arith.extui %245 : vector<16x128xi1> to vector<16x128xi32>
    %247 = vector.shape_cast %246 : vector<16x128xi32> to vector<1x16x128xi32>
    %cst_48 = arith.constant dense<0> : vector<1xi32>
    %248 = vector.multi_reduction <add>, %247, %cst_48 [1, 2] : vector<1x16x128xi32> to vector<1xi32>
    %249 = vector.shape_cast %248 : vector<1xi32> to vector<1x1x1xi32>
    %250 = vector.extract %249[0, 0, 0] : i32 from vector<1x1x1xi32>
    %c204_i32_49 = arith.constant 204 : i32
    %251 = arith.cmpi sge, %250, %c204_i32_49 : i32
    %252 = arith.select %251, %243, %242 : i32
    %c32_i32 = arith.constant 32 : i32
    %253 = arith.ori %252, %c32_i32 : i32
    %254 = vector.broadcast %253 : i32 to vector<16x128xi32>
    %255 = arith.cmpi sge, %2, %254 : vector<16x128xi32>
    %256 = arith.extui %255 : vector<16x128xi1> to vector<16x128xi32>
    %257 = vector.shape_cast %256 : vector<16x128xi32> to vector<1x16x128xi32>
    %cst_50 = arith.constant dense<0> : vector<1xi32>
    %258 = vector.multi_reduction <add>, %257, %cst_50 [1, 2] : vector<1x16x128xi32> to vector<1xi32>
    %259 = vector.shape_cast %258 : vector<1xi32> to vector<1x1x1xi32>
    %260 = vector.extract %259[0, 0, 0] : i32 from vector<1x1x1xi32>
    %c204_i32_51 = arith.constant 204 : i32
    %261 = arith.cmpi sge, %260, %c204_i32_51 : i32
    %262 = arith.select %261, %253, %252 : i32
    %c16_i32 = arith.constant 16 : i32
    %263 = arith.ori %262, %c16_i32 : i32
    %264 = vector.broadcast %263 : i32 to vector<16x128xi32>
    %265 = arith.cmpi sge, %2, %264 : vector<16x128xi32>
    %266 = arith.extui %265 : vector<16x128xi1> to vector<16x128xi32>
    %267 = vector.shape_cast %266 : vector<16x128xi32> to vector<1x16x128xi32>
    %cst_52 = arith.constant dense<0> : vector<1xi32>
    %268 = vector.multi_reduction <add>, %267, %cst_52 [1, 2] : vector<1x16x128xi32> to vector<1xi32>
    %269 = vector.shape_cast %268 : vector<1xi32> to vector<1x1x1xi32>
    %270 = vector.extract %269[0, 0, 0] : i32 from vector<1x1x1xi32>
    %c204_i32_53 = arith.constant 204 : i32
    %271 = arith.cmpi sge, %270, %c204_i32_53 : i32
    %272 = arith.select %271, %263, %262 : i32
    %c8_i32 = arith.constant 8 : i32
    %273 = arith.ori %272, %c8_i32 : i32
    %274 = vector.broadcast %273 : i32 to vector<16x128xi32>
    %275 = arith.cmpi sge, %2, %274 : vector<16x128xi32>
    %276 = arith.extui %275 : vector<16x128xi1> to vector<16x128xi32>
    %277 = vector.shape_cast %276 : vector<16x128xi32> to vector<1x16x128xi32>
    %cst_54 = arith.constant dense<0> : vector<1xi32>
    %278 = vector.multi_reduction <add>, %277, %cst_54 [1, 2] : vector<1x16x128xi32> to vector<1xi32>
    %279 = vector.shape_cast %278 : vector<1xi32> to vector<1x1x1xi32>
    %280 = vector.extract %279[0, 0, 0] : i32 from vector<1x1x1xi32>
    %c204_i32_55 = arith.constant 204 : i32
    %281 = arith.cmpi sge, %280, %c204_i32_55 : i32
    %282 = arith.select %281, %273, %272 : i32
    %c4_i32 = arith.constant 4 : i32
    %283 = arith.ori %282, %c4_i32 : i32
    %284 = vector.broadcast %283 : i32 to vector<16x128xi32>
    %285 = arith.cmpi sge, %2, %284 : vector<16x128xi32>
    %286 = arith.extui %285 : vector<16x128xi1> to vector<16x128xi32>
    %287 = vector.shape_cast %286 : vector<16x128xi32> to vector<1x16x128xi32>
    %cst_56 = arith.constant dense<0> : vector<1xi32>
    %288 = vector.multi_reduction <add>, %287, %cst_56 [1, 2] : vector<1x16x128xi32> to vector<1xi32>
    %289 = vector.shape_cast %288 : vector<1xi32> to vector<1x1x1xi32>
    %290 = vector.extract %289[0, 0, 0] : i32 from vector<1x1x1xi32>
    %c204_i32_57 = arith.constant 204 : i32
    %291 = arith.cmpi sge, %290, %c204_i32_57 : i32
    %292 = arith.select %291, %283, %282 : i32
    %c2_i32 = arith.constant 2 : i32
    %293 = arith.ori %292, %c2_i32 : i32
    %294 = vector.broadcast %293 : i32 to vector<16x128xi32>
    %295 = arith.cmpi sge, %2, %294 : vector<16x128xi32>
    %296 = arith.extui %295 : vector<16x128xi1> to vector<16x128xi32>
    %297 = vector.shape_cast %296 : vector<16x128xi32> to vector<1x16x128xi32>
    %cst_58 = arith.constant dense<0> : vector<1xi32>
    %298 = vector.multi_reduction <add>, %297, %cst_58 [1, 2] : vector<1x16x128xi32> to vector<1xi32>
    %299 = vector.shape_cast %298 : vector<1xi32> to vector<1x1x1xi32>
    %300 = vector.extract %299[0, 0, 0] : i32 from vector<1x1x1xi32>
    %c204_i32_59 = arith.constant 204 : i32
    %301 = arith.cmpi sge, %300, %c204_i32_59 : i32
    %302 = arith.select %301, %293, %292 : i32
    %c1_i32 = arith.constant 1 : i32
    %303 = arith.ori %302, %c1_i32 : i32
    %304 = vector.broadcast %303 : i32 to vector<16x128xi32>
    %305 = arith.cmpi sge, %2, %304 : vector<16x128xi32>
    %306 = arith.extui %305 : vector<16x128xi1> to vector<16x128xi32>
    %307 = vector.shape_cast %306 : vector<16x128xi32> to vector<1x16x128xi32>
    %cst_60 = arith.constant dense<0> : vector<1xi32>
    %308 = vector.multi_reduction <add>, %307, %cst_60 [1, 2] : vector<1x16x128xi32> to vector<1xi32>
    %309 = vector.shape_cast %308 : vector<1xi32> to vector<1x1x1xi32>
    %310 = vector.extract %309[0, 0, 0] : i32 from vector<1x1x1xi32>
    %c204_i32_61 = arith.constant 204 : i32
    %311 = arith.cmpi sge, %310, %c204_i32_61 : i32
    %312 = arith.select %311, %303, %302 : i32
    %313 = vector.broadcast %312 : i32 to vector<16x128xi32>
    %314 = arith.cmpi sge, %2, %313 : vector<16x128xi32>
    %cst_62 = arith.constant 0.000000e+00 : f32
    %315 = vector.broadcast %cst_62 : f32 to vector<16x128xf32>
    %316 = arith.select %314, %0, %315 : vector<16x128xi1>, vector<16x128xf32>
    %c0_63 = arith.constant 0 : index
    %c0_64 = arith.constant 0 : index
    %317 = vector.load %arg1[%c0_63, %c0_64] : memref<16x128xf32, #tpu.memory_space<vmem>>, vector<16x128xf32>
    tpu.vector_store %arg1[%c0_63, %c0_64], %316 {strides = array<i32>} : memref<16x128xf32, #tpu.memory_space<vmem>>, vector<16x128xf32>,
    return
  }
}

</mosaic_0001>

<bundles_post_ra>
// kernel: tpu_custom_call.1
= control target key start
LH: loop header
LB: loop body
LE: loop exit
PB: predicated region body
PF: predicated region fallthrough
CT: control target
= control target key end

     0   :  { %6 = vsyncpa [#allocation3], 0  ;;  %s1335_s0 = inlined_call_operand.hbm [shape: f32[16,128], index: 0, kind: input, shape index: {}]   ;;  %s1336_s1 = inlined_call_operand.hbm [shape: f32[16,128], index: 1, kind: output, shape index: {}]  }
   0x1   :  { %7 = vsyncpa [#allocation4], 0  ;;  %s1036_s6 = smov [#allocation2]   ;;  %s988_s10 = scalar_lea.hbm %s1335_s0, 256 }
   0x2   :  { %s13_s7 = sshll.u32 %s1036_s6, 4  ;;  %p989_p0 = scmp.ne.s32.totalorder %s1335_s0, %s988_s10  ;;  %s14_s7 = int_to_ptr.vmem [resolvable:$true] %s13_s7 }
   0x3   :  { %p992_p1 = scmp.lt.u32.totalorder %s988_s10, %s1335_s0 }
   0x5   :  { %p994_p2 = pnand %p992_p1, %p989_p0 }
   0x7   :  { %997 = shalt.err (!%p994_p2)
}
   0x8   :  { %s998_s15 = scalar_lea.vmem %s14_s7, 256  ;;  %p1003_p4 = scmp.lt.s32.totalorder %s14_s7, %s14_s7 }
   0x9   :  { %p999_p3 = scmp.ne.s32.totalorder %s14_s7, %s998_s15  ;;  %p1004_p5 = scmp.lt.s32.totalorder %s998_s15, %s998_s15 }
   0xb   :  { %p1005_p6 = por %p1004_p5, %p1003_p4 }
   0xd   :  { %p1006_p7 = pnand %p1005_p6, %p999_p3 }
   0xf   :  { %1009 = shalt.err (!%p1006_p7)
}
  0x10   :  { %s1037_s16 = smov 128   ;;  %s1038_s17 = smov 8  }
  0x11   :  { %19 = dma.hbm_to_vmem [thread:$0]  %s1335_s0, 256, %s14_s7, [#allocation3], %s1037_s16, %s1037_s16, %s1038_s17  }
  0x12   :  { %1032 = dma.done.wait [#allocation3], 256  }
  0x13   :  { %1033 = vsyncadd [#allocation3], 4294967040  ;;  %v23_v0 = vld [vmem:[#allocation2] sm:$0xff]  ;;  %v24_v1 = vld [vmem:[#allocation2 + $0x8] sm:$0xff]  ;;  %v1039_v4 = vmov 0  }
  0x14   :  { %v1066_v2 = vand.u32 2147483647, %v23_v0  ;;  %v1068_v3 = vand.u32 2147483647, %v24_v1 }
  0x16   :  { %vm29_vm0 = vcmp.ge.s32.totalorder %v1066_v2, 1073741824  ;;  %vm30_vm1 = vcmp.ge.s32.totalorder %v1068_v3, 1073741824 }
  0x17   :  { %v31_v5 = vsel %vm29_vm0, 1, %v1039_v4  ;;  %v32_v6 = vsel %vm30_vm1, 1, %v1039_v4 }
  0x18   :  { %v33_v7 = vadd.s32 %v32_v6, %v31_v5 }
  0x1a   :  { %v35_v8 = vshrl.u32 %v33_v7, 16  ;;  %v34_v9 = vand.u32 65535, %v33_v7 }
  0x1c   :  { %v37_v10 = vcvt.s32.f32 %v35_v8  ;;  %v36_v11 = vcvt.s32.f32 %v34_v9 }
  0x1e   :  { %40 = vadd.xlane.f32.xlu0 %v37_v10 }
  0x22   :  { %38 = vadd.xlane.f32.xlu0 %v36_v11 }
  0xab   :  { %v41_v12 = vpop.xlane.xlu0 %40 }
  0xac   :  { %v43_v13 = vcvt.f32.s32 %v41_v12 }
  0xae   :  { %v44_v15 = vshll.u32 %v43_v13, 16 }
  0xaf   :  { %v39_v14 = vpop.xlane.xlu0 %38 }
  0xb0   :  { %v42_v16 = vcvt.f32.s32 %v39_v14 }
  0xb2   :  { %v45_v17 = vadd.s32 %v44_v15, %v42_v16 }
  0xb4   :  { %v46_v18 = vrot.slane %v45_v17, 4 }
  0xb6   :  { %v47_v19 = vadd.s32 %v46_v18, %v45_v17 }
  0xb8   :  { %v48_v20 = vrot.slane %v47_v19, 2 }
  0xba   :  { %v49_v21 = vadd.s32 %v48_v20, %v47_v19 }
  0xbc   :  { %v50_v22 = vrot.slane %v49_v21, 1 }
  0xbe   :  { %v51_v23 = vadd.s32 %v50_v22, %v49_v21 }
  0xc0   :  { %919 = vpush %v51_v23 }
  0xf1   :  { %s920_s0 = spop %919 }
  0xf2   :  { %p53_p8 = scmp.ge.s32.totalorder %s920_s0, 204 }
  0xf4   :  { %s1074_s20 = scalar_select %p53_p8, 1073741824, 0 }
  0xf6   :  { %s55_s21 = sor.u32 536870912, %s1074_s20 }
  0xf7   :  { %v56_v24 = vstv %s55_s21 }
  0xf8   :  { %vm57_vm2 = vcmp.ge.s32.totalorder %v1066_v2, %v56_v24  ;;  %vm58_vm3 = vcmp.ge.s32.totalorder %v1068_v3, %v56_v24 }
  0xf9   :  { %v59_v25 = vsel %vm57_vm2, 1, %v1039_v4  ;;  %v60_v26 = vsel %vm58_vm3, 1, %v1039_v4 }
  0xfa   :  { %v61_v27 = vadd.s32 %v60_v26, %v59_v25 }
  0xfc   :  { %v63_v28 = vshrl.u32 %v61_v27, 16  ;;  %v62_v30 = vand.u32 65535, %v61_v27 }
  0xfe   :  { %v65_v29 = vcvt.s32.f32 %v63_v28  ;;  %v64_v31 = vcvt.s32.f32 %v62_v30 }
 0x100   :  { %68 = vadd.xlane.f32.xlu1 %v65_v29 }
 0x104   :  { %66 = vadd.xlane.f32.xlu1 %v64_v31 }
 0x18d   :  { %v69_v32 = vpop.xlane.xlu1 %68 }
 0x18e   :  { %v71_v33 = vcvt.f32.s32 %v69_v32 }
 0x190   :  { %v72_v35 = vshll.u32 %v71_v33, 16 }
 0x191   :  { %v67_v34 = vpop.xlane.xlu1 %66 }
 0x192   :  { %v70_v36 = vcvt.f32.s32 %v67_v34 }
 0x194   :  { %v73_v37 = vadd.s32 %v72_v35, %v70_v36 }
 0x196   :  { %v74_v38 = vrot.slane %v73_v37, 4 }
 0x198   :  { %v75_v39 = vadd.s32 %v74_v38, %v73_v37 }
 0x19a   :  { %v76_v40 = vrot.slane %v75_v39, 2 }
 0x19c   :  { %v77_v41 = vadd.s32 %v76_v40, %v75_v39 }
 0x19e   :  { %v78_v42 = vrot.slane %v77_v41, 1 }
 0x1a0   :  { %v79_v43 = vadd.s32 %v78_v42, %v77_v41 }
 0x1a2   :  { %921 = vpush %v79_v43 }
 0x1d3   :  { %s922_s22 = spop %921 }
 0x1d4   :  { %p81_p9 = scmp.ge.s32.totalorder %s922_s22, 204 }
 0x1d6   :  { %s1338_s21 = smov (!%p81_p9, %s55_s21), %s1074_s20 }
 0x1d7   :  { %s83_s23 = sor.u32 268435456, %s1338_s21 }
 0x1d8   :  { %v84_v44 = vstv %s83_s23 }
 0x1d9   :  { %vm85_vm4 = vcmp.ge.s32.totalorder %v1066_v2, %v84_v44  ;;  %vm86_vm5 = vcmp.ge.s32.totalorder %v1068_v3, %v84_v44 }
 0x1da   :  { %v87_v45 = vsel %vm85_vm4, 1, %v1039_v4  ;;  %v88_v46 = vsel %vm86_vm5, 1, %v1039_v4 }
 0x1db   :  { %v89_v47 = vadd.s32 %v88_v46, %v87_v45 }
 0x1dd   :  { %v91_v48 = vshrl.u32 %v89_v47, 16  ;;  %v90_v49 = vand.u32 65535, %v89_v47 }
 0x1df   :  { %v93_v50 = vcvt.s32.f32 %v91_v48  ;;  %v92_v51 = vcvt.s32.f32 %v90_v49 }
 0x1e1   :  { %96 = vadd.xlane.f32.xlu0 %v93_v50  ;;  %94 = vadd.xlane.f32.xlu1 %v92_v51 }
 0x26e   :  { %v97_v52 = vpop.xlane.xlu0 %96  ;;  %v95_v53 = vpop.xlane.xlu1 %94 }
 0x26f   :  { %v99_v54 = vcvt.f32.s32 %v97_v52  ;;  %v98_v56 = vcvt.f32.s32 %v95_v53 }
 0x271   :  { %v100_v55 = vshll.u32 %v99_v54, 16 }
 0x273   :  { %v101_v57 = vadd.s32 %v100_v55, %v98_v56 }
 0x275   :  { %v102_v58 = vrot.slane %v101_v57, 4 }
 0x277   :  { %v103_v59 = vadd.s32 %v102_v58, %v101_v57 }
 0x279   :  { %v104_v60 = vrot.slane %v103_v59, 2 }
 0x27b   :  { %v105_v61 = vadd.s32 %v104_v60, %v103_v59 }
 0x27d   :  { %v106_v62 = vrot.slane %v105_v61, 1 }
 0x27f   :  { %v107_v63 = vadd.s32 %v106_v62, %v105_v61 }
 0x281   :  { %923 = vpush %v107_v63 }
 0x2b2   :  { %s924_s24 = spop %923 }
 0x2b3   :  { %p109_p10 = scmp.ge.s32.totalorder %s924_s24, 204 }
 0x2b5   :  { %s1340_s23 = smov (!%p109_p10, %s83_s23), %s1338_s21 }
 0x2b6   :  { %s111_s25 = sor.u32 134217728, %s1340_s23 }
 0x2b7   :  { %v112_v0 = vstv %s111_s25 }
 0x2b8   :  { %vm113_vm6 = vcmp.ge.s32.totalorder %v1066_v2, %v112_v0  ;;  %vm114_vm7 = vcmp.ge.s32.totalorder %v1068_v3, %v112_v0 }
 0x2b9   :  { %v115_v1 = vsel %vm113_vm6, 1, %v1039_v4  ;;  %v116_v5 = vsel %vm114_vm7, 1, %v1039_v4 }
 0x2ba   :  { %v117_v6 = vadd.s32 %v116_v5, %v115_v1 }
 0x2bc   :  { %v119_v7 = vshrl.u32 %v117_v6, 16  ;;  %v118_v8 = vand.u32 65535, %v117_v6 }
 0x2be   :  { %v121_v9 = vcvt.s32.f32 %v119_v7  ;;  %v120_v10 = vcvt.s32.f32 %v118_v8 }
 0x2c0   :  { %124 = vadd.xlane.f32.xlu0 %v121_v9  ;;  %122 = vadd.xlane.f32.xlu1 %v120_v10 }
 0x34d   :  { %v125_v11 = vpop.xlane.xlu0 %124  ;;  %v123_v12 = vpop.xlane.xlu1 %122 }
 0x34e   :  { %v127_v13 = vcvt.f32.s32 %v125_v11  ;;  %v126_v15 = vcvt.f32.s32 %v123_v12 }
 0x350   :  { %v128_v14 = vshll.u32 %v127_v13, 16 }
 0x352   :  { %v129_v16 = vadd.s32 %v128_v14, %v126_v15 }
 0x354   :  { %v130_v17 = vrot.slane %v129_v16, 4 }
 0x356   :  { %v131_v18 = vadd.s32 %v130_v17, %v129_v16 }
 0x358   :  { %v132_v19 = vrot.slane %v131_v18, 2 }
 0x35a   :  { %v133_v20 = vadd.s32 %v132_v19, %v131_v18 }
 0x35c   :  { %v134_v21 = vrot.slane %v133_v20, 1 }
 0x35e   :  { %v135_v22 = vadd.s32 %v134_v21, %v133_v20 }
 0x360   :  { %925 = vpush %v135_v22 }
 0x391   :  { %s926_s26 = spop %925 }
 0x392   :  { %p137_p11 = scmp.ge.s32.totalorder %s926_s26, 204 }
 0x394   :  { %s1342_s25 = smov (!%p137_p11, %s111_s25), %s1340_s23 }
 0x395   :  { %s139_s27 = sor.u32 67108864, %s1342_s25 }
 0x396   :  { %v140_v23 = vstv %s139_s27 }
 0x397   :  { %vm141_vm8 = vcmp.ge.s32.totalorder %v1066_v2, %v140_v23  ;;  %vm142_vm9 = vcmp.ge.s32.totalorder %v1068_v3, %v140_v23 }
 0x398   :  { %v143_v24 = vsel %vm141_vm8, 1, %v1039_v4  ;;  %v144_v25 = vsel %vm142_vm9, 1, %v1039_v4 }
 0x399   :  { %v145_v26 = vadd.s32 %v144_v25, %v143_v24 }
 0x39b   :  { %v147_v27 = vshrl.u32 %v145_v26, 16  ;;  %v146_v28 = vand.u32 65535, %v145_v26 }
 0x39d   :  { %v149_v29 = vcvt.s32.f32 %v147_v27  ;;  %v148_v30 = vcvt.s32.f32 %v146_v28 }
 0x39f   :  { %152 = vadd.xlane.f32.xlu0 %v149_v29  ;;  %150 = vadd.xlane.f32.xlu1 %v148_v30 }
 0x42c   :  { %v153_v31 = vpop.xlane.xlu0 %152  ;;  %v151_v32 = vpop.xlane.xlu1 %150 }
 0x42d   :  { %v155_v33 = vcvt.f32.s32 %v153_v31  ;;  %v154_v35 = vcvt.f32.s32 %v151_v32 }
 0x42f   :  { %v156_v34 = vshll.u32 %v155_v33, 16 }
 0x431   :  { %v157_v36 = vadd.s32 %v156_v34, %v154_v35 }
 0x433   :  { %v158_v37 = vrot.slane %v157_v36, 4 }
 0x435   :  { %v159_v38 = vadd.s32 %v158_v37, %v157_v36 }
 0x437   :  { %v160_v39 = vrot.slane %v159_v38, 2 }
 0x439   :  { %v161_v40 = vadd.s32 %v160_v39, %v159_v38 }
 0x43b   :  { %v162_v41 = vrot.slane %v161_v40, 1 }
 0x43d   :  { %v163_v42 = vadd.s32 %v162_v41, %v161_v40 }
 0x43f   :  { %927 = vpush %v163_v42 }
 0x470   :  { %s928_s28 = spop %927 }
 0x471   :  { %p165_p12 = scmp.ge.s32.totalorder %s928_s28, 204 }
 0x473   :  { %s1344_s27 = smov (!%p165_p12, %s139_s27), %s1342_s25 }
 0x474   :  { %s167_s29 = sor.u32 33554432, %s1344_s27 }
 0x475   :  { %v168_v43 = vstv %s167_s29 }
 0x476   :  { %vm169_vm10 = vcmp.ge.s32.totalorder %v1066_v2, %v168_v43  ;;  %vm170_vm11 = vcmp.ge.s32.totalorder %v1068_v3, %v168_v43 }
 0x477   :  { %v171_v44 = vsel %vm169_vm10, 1, %v1039_v4  ;;  %v172_v45 = vsel %vm170_vm11, 1, %v1039_v4 }
 0x478   :  { %v173_v46 = vadd.s32 %v172_v45, %v171_v44 }
 0x47a   :  { %v175_v47 = vshrl.u32 %v173_v46, 16  ;;  %v174_v48 = vand.u32 65535, %v173_v46 }
 0x47c   :  { %v177_v49 = vcvt.s32.f32 %v175_v47  ;;  %v176_v50 = vcvt.s32.f32 %v174_v48 }
 0x47e   :  { %180 = vadd.xlane.f32.xlu0 %v177_v49  ;;  %178 = vadd.xlane.f32.xlu1 %v176_v50 }
 0x50b   :  { %v181_v51 = vpop.xlane.xlu0 %180  ;;  %v179_v52 = vpop.xlane.xlu1 %178 }
 0x50c   :  { %v183_v53 = vcvt.f32.s32 %v181_v51  ;;  %v182_v55 = vcvt.f32.s32 %v179_v52 }
 0x50e   :  { %v184_v54 = vshll.u32 %v183_v53, 16 }
 0x510   :  { %v185_v56 = vadd.s32 %v184_v54, %v182_v55 }
 0x512   :  { %v186_v57 = vrot.slane %v185_v56, 4 }
 0x514   :  { %v187_v58 = vadd.s32 %v186_v57, %v185_v56 }
 0x516   :  { %v188_v59 = vrot.slane %v187_v58, 2 }
 0x518   :  { %v189_v60 = vadd.s32 %v188_v59, %v187_v58 }
 0x51a   :  { %v190_v61 = vrot.slane %v189_v60, 1 }
 0x51c   :  { %v191_v62 = vadd.s32 %v190_v61, %v189_v60 }
 0x51e   :  { %929 = vpush %v191_v62 }
 0x54f   :  { %s930_s30 = spop %929 }
 0x550   :  { %p193_p13 = scmp.ge.s32.totalorder %s930_s30, 204 }
 0x552   :  { %s1346_s29 = smov (!%p193_p13, %s167_s29), %s1344_s27 }
 0x553   :  { %s195_s2 = sor.u32 16777216, %s1346_s29 }
 0x554   :  { %v196_v63 = vstv %s195_s2 }
 0x555   :  { %vm197_vm12 = vcmp.ge.s32.totalorder %v1066_v2, %v196_v63  ;;  %vm198_vm13 = vcmp.ge.s32.totalorder %v1068_v3, %v196_v63 }
 0x556   :  { %v199_v0 = vsel %vm197_vm12, 1, %v1039_v4  ;;  %v200_v1 = vsel %vm198_vm13, 1, %v1039_v4 }
 0x557   :  { %v201_v5 = vadd.s32 %v200_v1, %v199_v0 }
 0x559   :  { %v203_v6 = vshrl.u32 %v201_v5, 16  ;;  %v202_v7 = vand.u32 65535, %v201_v5 }
 0x55b   :  { %v205_v8 = vcvt.s32.f32 %v203_v6  ;;  %v204_v9 = vcvt.s32.f32 %v202_v7 }
 0x55d   :  { %208 = vadd.xlane.f32.xlu0 %v205_v8  ;;  %206 = vadd.xlane.f32.xlu1 %v204_v9 }
 0x5ea   :  { %v209_v10 = vpop.xlane.xlu0 %208  ;;  %v207_v11 = vpop.xlane.xlu1 %206 }
 0x5eb   :  { %v211_v12 = vcvt.f32.s32 %v209_v10  ;;  %v210_v14 = vcvt.f32.s32 %v207_v11 }
 0x5ed   :  { %v212_v13 = vshll.u32 %v211_v12, 16 }
 0x5ef   :  { %v213_v15 = vadd.s32 %v212_v13, %v210_v14 }
 0x5f1   :  { %v214_v16 = vrot.slane %v213_v15, 4 }
 0x5f3   :  { %v215_v17 = vadd.s32 %v214_v16, %v213_v15 }
 0x5f5   :  { %v216_v18 = vrot.slane %v215_v17, 2 }
 0x5f7   :  { %v217_v19 = vadd.s32 %v216_v18, %v215_v17 }
 0x5f9   :  { %v218_v20 = vrot.slane %v217_v19, 1 }
 0x5fb   :  { %v219_v21 = vadd.s32 %v218_v20, %v217_v19 }
 0x5fd   :  { %931 = vpush %v219_v21 }
 0x62e   :  { %s932_s3 = spop %931 }
 0x62f   :  { %p221_p0 = scmp.ge.s32.totalorder %s932_s3, 204 }
 0x631   :  { %s1348_s2 = smov (!%p221_p0, %s195_s2), %s1346_s29 }
 0x632   :  { %s223_s4 = sor.u32 8388608, %s1348_s2 }
 0x633   :  { %v224_v22 = vstv %s223_s4 }
 0x634   :  { %vm225_vm14 = vcmp.ge.s32.totalorder %v1066_v2, %v224_v22  ;;  %vm226_vm15 = vcmp.ge.s32.totalorder %v1068_v3, %v224_v22 }
 0x635   :  { %v227_v23 = vsel %vm225_vm14, 1, %v1039_v4  ;;  %v228_v24 = vsel %vm226_vm15, 1, %v1039_v4 }
 0x636   :  { %v229_v25 = vadd.s32 %v228_v24, %v227_v23 }
 0x638   :  { %v231_v26 = vshrl.u32 %v229_v25, 16  ;;  %v230_v27 = vand.u32 65535, %v229_v25 }
 0x63a   :  { %v233_v28 = vcvt.s32.f32 %v231_v26  ;;  %v232_v29 = vcvt.s32.f32 %v230_v27 }
 0x63c   :  { %236 = vadd.xlane.f32.xlu0 %v233_v28  ;;  %234 = vadd.xlane.f32.xlu1 %v232_v29 }
 0x6c9   :  { %v237_v30 = vpop.xlane.xlu0 %236  ;;  %v235_v31 = vpop.xlane.xlu1 %234 }
 0x6ca   :  { %v239_v32 = vcvt.f32.s32 %v237_v30  ;;  %v238_v34 = vcvt.f32.s32 %v235_v31 }
 0x6cc   :  { %v240_v33 = vshll.u32 %v239_v32, 16 }
 0x6ce   :  { %v241_v35 = vadd.s32 %v240_v33, %v238_v34 }
 0x6d0   :  { %v242_v36 = vrot.slane %v241_v35, 4 }
 0x6d2   :  { %v243_v37 = vadd.s32 %v242_v36, %v241_v35 }
 0x6d4   :  { %v244_v38 = vrot.slane %v243_v37, 2 }
 0x6d6   :  { %v245_v39 = vadd.s32 %v244_v38, %v243_v37 }
 0x6d8   :  { %v246_v40 = vrot.slane %v245_v39, 1 }
 0x6da   :  { %v247_v41 = vadd.s32 %v246_v40, %v245_v39 }
 0x6dc   :  { %933 = vpush %v247_v41 }
 0x70d   :  { %s934_s5 = spop %933 }
 0x70e   :  { %p249_p1 = scmp.ge.s32.totalorder %s934_s5, 204 }
 0x710   :  { %s1350_s4 = smov (!%p249_p1, %s223_s4), %s1348_s2 }
 0x711   :  { %s251_s6 = sor.u32 4194304, %s1350_s4 }
 0x712   :  { %v252_v42 = vstv %s251_s6 }
 0x713   :  { %vm253_vm0 = vcmp.ge.s32.totalorder %v1066_v2, %v252_v42  ;;  %vm254_vm1 = vcmp.ge.s32.totalorder %v1068_v3, %v252_v42 }
 0x714   :  { %v255_v43 = vsel %vm253_vm0, 1, %v1039_v4  ;;  %v256_v44 = vsel %vm254_vm1, 1, %v1039_v4 }
 0x715   :  { %v257_v45 = vadd.s32 %v256_v44, %v255_v43 }
 0x717   :  { %v259_v46 = vshrl.u32 %v257_v45, 16  ;;  %v258_v47 = vand.u32 65535, %v257_v45 }
 0x719   :  { %v261_v48 = vcvt.s32.f32 %v259_v46  ;;  %v260_v49 = vcvt.s32.f32 %v258_v47 }
 0x71b   :  { %264 = vadd.xlane.f32.xlu0 %v261_v48  ;;  %262 = vadd.xlane.f32.xlu1 %v260_v49 }
 0x7a8   :  { %v265_v50 = vpop.xlane.xlu0 %264  ;;  %v263_v51 = vpop.xlane.xlu1 %262 }
 0x7a9   :  { %v267_v52 = vcvt.f32.s32 %v265_v50  ;;  %v266_v54 = vcvt.f32.s32 %v263_v51 }
 0x7ab   :  { %v268_v53 = vshll.u32 %v267_v52, 16 }
 0x7ad   :  { %v269_v55 = vadd.s32 %v268_v53, %v266_v54 }
 0x7af   :  { %v270_v56 = vrot.slane %v269_v55, 4 }
 0x7b1   :  { %v271_v57 = vadd.s32 %v270_v56, %v269_v55 }
 0x7b3   :  { %v272_v58 = vrot.slane %v271_v57, 2 }
 0x7b5   :  { %v273_v59 = vadd.s32 %v272_v58, %v271_v57 }
 0x7b7   :  { %v274_v60 = vrot.slane %v273_v59, 1 }
 0x7b9   :  { %v275_v61 = vadd.s32 %v274_v60, %v273_v59 }
 0x7bb   :  { %935 = vpush %v275_v61 }
 0x7ec   :  { %s936_s7 = spop %935 }
 0x7ed   :  { %p277_p2 = scmp.ge.s32.totalorder %s936_s7, 204 }
 0x7ef   :  { %s1352_s6 = smov (!%p277_p2, %s251_s6), %s1350_s4 }
 0x7f0   :  { %s279_s8 = sor.u32 2097152, %s1352_s6 }
 0x7f1   :  { %v280_v62 = vstv %s279_s8 }
 0x7f2   :  { %vm281_vm2 = vcmp.ge.s32.totalorder %v1066_v2, %v280_v62  ;;  %vm282_vm3 = vcmp.ge.s32.totalorder %v1068_v3, %v280_v62 }
 0x7f3   :  { %v283_v63 = vsel %vm281_vm2, 1, %v1039_v4  ;;  %v284_v0 = vsel %vm282_vm3, 1, %v1039_v4 }
 0x7f4   :  { %v285_v1 = vadd.s32 %v284_v0, %v283_v63 }
 0x7f6   :  { %v287_v5 = vshrl.u32 %v285_v1, 16  ;;  %v286_v6 = vand.u32 65535, %v285_v1 }
 0x7f8   :  { %v289_v7 = vcvt.s32.f32 %v287_v5  ;;  %v288_v8 = vcvt.s32.f32 %v286_v6 }
 0x7fa   :  { %292 = vadd.xlane.f32.xlu0 %v289_v7  ;;  %290 = vadd.xlane.f32.xlu1 %v288_v8 }
 0x887   :  { %v293_v9 = vpop.xlane.xlu0 %292  ;;  %v291_v10 = vpop.xlane.xlu1 %290 }
 0x888   :  { %v295_v11 = vcvt.f32.s32 %v293_v9  ;;  %v294_v13 = vcvt.f32.s32 %v291_v10 }
 0x88a   :  { %v296_v12 = vshll.u32 %v295_v11, 16 }
 0x88c   :  { %v297_v14 = vadd.s32 %v296_v12, %v294_v13 }
 0x88e   :  { %v298_v15 = vrot.slane %v297_v14, 4 }
 0x890   :  { %v299_v16 = vadd.s32 %v298_v15, %v297_v14 }
 0x892   :  { %v300_v17 = vrot.slane %v299_v16, 2 }
 0x894   :  { %v301_v18 = vadd.s32 %v300_v17, %v299_v16 }
 0x896   :  { %v302_v19 = vrot.slane %v301_v18, 1 }
 0x898   :  { %v303_v20 = vadd.s32 %v302_v19, %v301_v18 }
 0x89a   :  { %937 = vpush %v303_v20 }
 0x8cb   :  { %s938_s9 = spop %937 }
 0x8cc   :  { %p305_p3 = scmp.ge.s32.totalorder %s938_s9, 204 }
 0x8ce   :  { %s1354_s8 = smov (!%p305_p3, %s279_s8), %s1352_s6 }
 0x8cf   :  { %s307_s10 = sor.u32 1048576, %s1354_s8 }
 0x8d0   :  { %v308_v21 = vstv %s307_s10 }
 0x8d1   :  { %vm309_vm4 = vcmp.ge.s32.totalorder %v1066_v2, %v308_v21  ;;  %vm310_vm5 = vcmp.ge.s32.totalorder %v1068_v3, %v308_v21 }
 0x8d2   :  { %v311_v22 = vsel %vm309_vm4, 1, %v1039_v4  ;;  %v312_v23 = vsel %vm310_vm5, 1, %v1039_v4 }
 0x8d3   :  { %v313_v24 = vadd.s32 %v312_v23, %v311_v22 }
 0x8d5   :  { %v315_v25 = vshrl.u32 %v313_v24, 16  ;;  %v314_v26 = vand.u32 65535, %v313_v24 }
 0x8d7   :  { %v317_v27 = vcvt.s32.f32 %v315_v25  ;;  %v316_v28 = vcvt.s32.f32 %v314_v26 }
 0x8d9   :  { %320 = vadd.xlane.f32.xlu0 %v317_v27  ;;  %318 = vadd.xlane.f32.xlu1 %v316_v28 }
 0x966   :  { %v321_v29 = vpop.xlane.xlu0 %320  ;;  %v319_v30 = vpop.xlane.xlu1 %318 }
 0x967   :  { %v323_v31 = vcvt.f32.s32 %v321_v29  ;;  %v322_v33 = vcvt.f32.s32 %v319_v30 }
 0x969   :  { %v324_v32 = vshll.u32 %v323_v31, 16 }
 0x96b   :  { %v325_v34 = vadd.s32 %v324_v32, %v322_v33 }
 0x96d   :  { %v326_v35 = vrot.slane %v325_v34, 4 }
 0x96f   :  { %v327_v36 = vadd.s32 %v326_v35, %v325_v34 }
 0x971   :  { %v328_v37 = vrot.slane %v327_v36, 2 }
 0x973   :  { %v329_v38 = vadd.s32 %v328_v37, %v327_v36 }
 0x975   :  { %v330_v39 = vrot.slane %v329_v38, 1 }
 0x977   :  { %v331_v40 = vadd.s32 %v330_v39, %v329_v38 }
 0x979   :  { %939 = vpush %v331_v40 }
 0x9aa   :  { %s940_s11 = spop %939 }
 0x9ab   :  { %p333_p4 = scmp.ge.s32.totalorder %s940_s11, 204 }
 0x9ad   :  { %s1356_s10 = smov (!%p333_p4, %s307_s10), %s1354_s8 }
 0x9ae   :  { %s335_s12 = sor.u32 524288, %s1356_s10 }
 0x9af   :  { %v336_v41 = vstv %s335_s12 }
 0x9b0   :  { %vm337_vm6 = vcmp.ge.s32.totalorder %v1066_v2, %v336_v41  ;;  %vm338_vm7 = vcmp.ge.s32.totalorder %v1068_v3, %v336_v41 }
 0x9b1   :  { %v339_v42 = vsel %vm337_vm6, 1, %v1039_v4  ;;  %v340_v43 = vsel %vm338_vm7, 1, %v1039_v4 }
 0x9b2   :  { %v341_v44 = vadd.s32 %v340_v43, %v339_v42 }
 0x9b4   :  { %v343_v45 = vshrl.u32 %v341_v44, 16  ;;  %v342_v46 = vand.u32 65535, %v341_v44 }
 0x9b6   :  { %v345_v47 = vcvt.s32.f32 %v343_v45  ;;  %v344_v48 = vcvt.s32.f32 %v342_v46 }
 0x9b8   :  { %348 = vadd.xlane.f32.xlu0 %v345_v47  ;;  %346 = vadd.xlane.f32.xlu1 %v344_v48 }
 0xa45   :  { %v349_v49 = vpop.xlane.xlu0 %348  ;;  %v347_v50 = vpop.xlane.xlu1 %346 }
 0xa46   :  { %v351_v51 = vcvt.f32.s32 %v349_v49  ;;  %v350_v53 = vcvt.f32.s32 %v347_v50 }
 0xa48   :  { %v352_v52 = vshll.u32 %v351_v51, 16 }
 0xa4a   :  { %v353_v54 = vadd.s32 %v352_v52, %v350_v53 }
 0xa4c   :  { %v354_v55 = vrot.slane %v353_v54, 4 }
 0xa4e   :  { %v355_v56 = vadd.s32 %v354_v55, %v353_v54 }
 0xa50   :  { %v356_v57 = vrot.slane %v355_v56, 2 }
 0xa52   :  { %v357_v58 = vadd.s32 %v356_v57, %v355_v56 }
 0xa54   :  { %v358_v59 = vrot.slane %v357_v58, 1 }
 0xa56   :  { %v359_v60 = vadd.s32 %v358_v59, %v357_v58 }
 0xa58   :  { %941 = vpush %v359_v60 }
 0xa89   :  { %s942_s13 = spop %941 }
 0xa8a   :  { %p361_p5 = scmp.ge.s32.totalorder %s942_s13, 204 }
 0xa8c   :  { %s1358_s12 = smov (!%p361_p5, %s335_s12), %s1356_s10 }
 0xa8d   :  { %s363_s14 = sor.u32 262144, %s1358_s12 }
 0xa8e   :  { %v364_v61 = vstv %s363_s14 }
 0xa8f   :  { %vm365_vm8 = vcmp.ge.s32.totalorder %v1066_v2, %v364_v61  ;;  %vm366_vm9 = vcmp.ge.s32.totalorder %v1068_v3, %v364_v61 }
 0xa90   :  { %v367_v62 = vsel %vm365_vm8, 1, %v1039_v4  ;;  %v368_v63 = vsel %vm366_vm9, 1, %v1039_v4 }
 0xa91   :  { %v369_v0 = vadd.s32 %v368_v63, %v367_v62 }
 0xa93   :  { %v371_v1 = vshrl.u32 %v369_v0, 16  ;;  %v370_v5 = vand.u32 65535, %v369_v0 }
 0xa95   :  { %v373_v6 = vcvt.s32.f32 %v371_v1  ;;  %v372_v7 = vcvt.s32.f32 %v370_v5 }
 0xa97   :  { %376 = vadd.xlane.f32.xlu0 %v373_v6  ;;  %374 = vadd.xlane.f32.xlu1 %v372_v7 }
 0xb24   :  { %v377_v8 = vpop.xlane.xlu0 %376  ;;  %v375_v9 = vpop.xlane.xlu1 %374 }
 0xb25   :  { %v379_v10 = vcvt.f32.s32 %v377_v8  ;;  %v378_v12 = vcvt.f32.s32 %v375_v9 }
 0xb27   :  { %v380_v11 = vshll.u32 %v379_v10, 16 }
 0xb29   :  { %v381_v13 = vadd.s32 %v380_v11, %v378_v12 }
 0xb2b   :  { %v382_v14 = vrot.slane %v381_v13, 4 }
 0xb2d   :  { %v383_v15 = vadd.s32 %v382_v14, %v381_v13 }
 0xb2f   :  { %v384_v16 = vrot.slane %v383_v15, 2 }
 0xb31   :  { %v385_v17 = vadd.s32 %v384_v16, %v383_v15 }
 0xb33   :  { %v386_v18 = vrot.slane %v385_v17, 1 }
 0xb35   :  { %v387_v19 = vadd.s32 %v386_v18, %v385_v17 }
 0xb37   :  { %943 = vpush %v387_v19 }
 0xb68   :  { %s944_s15 = spop %943 }
 0xb69   :  { %p389_p6 = scmp.ge.s32.totalorder %s944_s15, 204 }
 0xb6b   :  { %s1360_s14 = smov (!%p389_p6, %s363_s14), %s1358_s12 }
 0xb6c   :  { %s391_s18 = sor.u32 131072, %s1360_s14 }
 0xb6d   :  { %v392_v20 = vstv %s391_s18 }
 0xb6e   :  { %vm393_vm10 = vcmp.ge.s32.totalorder %v1066_v2, %v392_v20  ;;  %vm394_vm11 = vcmp.ge.s32.totalorder %v1068_v3, %v392_v20 }
 0xb6f   :  { %v395_v21 = vsel %vm393_vm10, 1, %v1039_v4  ;;  %v396_v22 = vsel %vm394_vm11, 1, %v1039_v4 }
 0xb70   :  { %v397_v23 = vadd.s32 %v396_v22, %v395_v21 }
 0xb72   :  { %v399_v24 = vshrl.u32 %v397_v23, 16  ;;  %v398_v25 = vand.u32 65535, %v397_v23 }
 0xb74   :  { %v401_v26 = vcvt.s32.f32 %v399_v24  ;;  %v400_v27 = vcvt.s32.f32 %v398_v25 }
 0xb76   :  { %404 = vadd.xlane.f32.xlu0 %v401_v26  ;;  %402 = vadd.xlane.f32.xlu1 %v400_v27 }
 0xc03   :  { %v405_v28 = vpop.xlane.xlu0 %404  ;;  %v403_v29 = vpop.xlane.xlu1 %402 }
 0xc04   :  { %v407_v30 = vcvt.f32.s32 %v405_v28  ;;  %v406_v32 = vcvt.f32.s32 %v403_v29 }
 0xc06   :  { %v408_v31 = vshll.u32 %v407_v30, 16 }
 0xc08   :  { %v409_v33 = vadd.s32 %v408_v31, %v406_v32 }
 0xc0a   :  { %v410_v34 = vrot.slane %v409_v33, 4 }
 0xc0c   :  { %v411_v35 = vadd.s32 %v410_v34, %v409_v33 }
 0xc0e   :  { %v412_v36 = vrot.slane %v411_v35, 2 }
 0xc10   :  { %v413_v37 = vadd.s32 %v412_v36, %v411_v35 }
 0xc12   :  { %v414_v38 = vrot.slane %v413_v37, 1 }
 0xc14   :  { %v415_v39 = vadd.s32 %v414_v38, %v413_v37 }
 0xc16   :  { %945 = vpush %v415_v39 }
 0xc47   :  { %s946_s19 = spop %945 }
 0xc48   :  { %p417_p7 = scmp.ge.s32.totalorder %s946_s19, 204 }
 0xc4a   :  { %s1362_s18 = smov (!%p417_p7, %s391_s18), %s1360_s14 }
 0xc4b   :  { %s419_s0 = sor.u32 65536, %s1362_s18 }
 0xc4c   :  { %v420_v40 = vstv %s419_s0 }
 0xc4d   :  { %vm421_vm12 = vcmp.ge.s32.totalorder %v1066_v2, %v420_v40  ;;  %vm422_vm13 = vcmp.ge.s32.totalorder %v1068_v3, %v420_v40 }
 0xc4e   :  { %v423_v41 = vsel %vm421_vm12, 1, %v1039_v4  ;;  %v424_v42 = vsel %vm422_vm13, 1, %v1039_v4 }
 0xc4f   :  { %v425_v43 = vadd.s32 %v424_v42, %v423_v41 }
 0xc51   :  { %v427_v44 = vshrl.u32 %v425_v43, 16  ;;  %v426_v45 = vand.u32 65535, %v425_v43 }
 0xc53   :  { %v429_v46 = vcvt.s32.f32 %v427_v44  ;;  %v428_v47 = vcvt.s32.f32 %v426_v45 }
 0xc55   :  { %432 = vadd.xlane.f32.xlu0 %v429_v46  ;;  %430 = vadd.xlane.f32.xlu1 %v428_v47 }
 0xce2   :  { %v433_v48 = vpop.xlane.xlu0 %432  ;;  %v431_v49 = vpop.xlane.xlu1 %430 }
 0xce3   :  { %v435_v50 = vcvt.f32.s32 %v433_v48  ;;  %v434_v52 = vcvt.f32.s32 %v431_v49 }
 0xce5   :  { %v436_v51 = vshll.u32 %v435_v50, 16 }
 0xce7   :  { %v437_v53 = vadd.s32 %v436_v51, %v434_v52 }
 0xce9   :  { %v438_v54 = vrot.slane %v437_v53, 4 }
 0xceb   :  { %v439_v55 = vadd.s32 %v438_v54, %v437_v53 }
 0xced   :  { %v440_v56 = vrot.slane %v439_v55, 2 }
 0xcef   :  { %v441_v57 = vadd.s32 %v440_v56, %v439_v55 }
 0xcf1   :  { %v442_v58 = vrot.slane %v441_v57, 1 }
 0xcf3   :  { %v443_v59 = vadd.s32 %v442_v58, %v441_v57 }
 0xcf5   :  { %947 = vpush %v443_v59 }
 0xd26   :  { %s948_s20 = spop %947 }
 0xd27   :  { %p445_p8 = scmp.ge.s32.totalorder %s948_s20, 204 }
 0xd29   :  { %s1364_s0 = smov (!%p445_p8, %s419_s0), %s1362_s18 }
 0xd2a   :  { %s447_s21 = sor.u32 32768, %s1364_s0 }
 0xd2b   :  { %v448_v60 = vstv %s447_s21 }
 0xd2c   :  { %vm449_vm14 = vcmp.ge.s32.totalorder %v1066_v2, %v448_v60  ;;  %vm450_vm15 = vcmp.ge.s32.totalorder %v1068_v3, %v448_v60 }
 0xd2d   :  { %v451_v61 = vsel %vm449_vm14, 1, %v1039_v4  ;;  %v452_v62 = vsel %vm450_vm15, 1, %v1039_v4 }
 0xd2e   :  { %v453_v63 = vadd.s32 %v452_v62, %v451_v61 }
 0xd30   :  { %v455_v0 = vshrl.u32 %v453_v63, 16  ;;  %v454_v1 = vand.u32 65535, %v453_v63 }
 0xd32   :  { %v457_v5 = vcvt.s32.f32 %v455_v0  ;;  %v456_v6 = vcvt.s32.f32 %v454_v1 }
 0xd34   :  { %460 = vadd.xlane.f32.xlu0 %v457_v5  ;;  %458 = vadd.xlane.f32.xlu1 %v456_v6 }
 0xdc1   :  { %v461_v7 = vpop.xlane.xlu0 %460  ;;  %v459_v8 = vpop.xlane.xlu1 %458 }
 0xdc2   :  { %v463_v9 = vcvt.f32.s32 %v461_v7  ;;  %v462_v11 = vcvt.f32.s32 %v459_v8 }
 0xdc4   :  { %v464_v10 = vshll.u32 %v463_v9, 16 }
 0xdc6   :  { %v465_v12 = vadd.s32 %v464_v10, %v462_v11 }
 0xdc8   :  { %v466_v13 = vrot.slane %v465_v12, 4 }
 0xdca   :  { %v467_v14 = vadd.s32 %v466_v13, %v465_v12 }
 0xdcc   :  { %v468_v15 = vrot.slane %v467_v14, 2 }
 0xdce   :  { %v469_v16 = vadd.s32 %v468_v15, %v467_v14 }
 0xdd0   :  { %v470_v17 = vrot.slane %v469_v16, 1 }
 0xdd2   :  { %v471_v18 = vadd.s32 %v470_v17, %v469_v16 }
 0xdd4   :  { %949 = vpush %v471_v18 }
 0xe05   :  { %s950_s22 = spop %949 }
 0xe06   :  { %p473_p9 = scmp.ge.s32.totalorder %s950_s22, 204 }
 0xe08   :  { %s1366_s21 = smov (!%p473_p9, %s447_s21), %s1364_s0 }
 0xe09   :  { %s475_s23 = sor.u32 16384, %s1366_s21 }
 0xe0a   :  { %v476_v19 = vstv %s475_s23 }
 0xe0b   :  { %vm477_vm0 = vcmp.ge.s32.totalorder %v1066_v2, %v476_v19  ;;  %vm478_vm1 = vcmp.ge.s32.totalorder %v1068_v3, %v476_v19 }
 0xe0c   :  { %v479_v20 = vsel %vm477_vm0, 1, %v1039_v4  ;;  %v480_v21 = vsel %vm478_vm1, 1, %v1039_v4 }
 0xe0d   :  { %v481_v22 = vadd.s32 %v480_v21, %v479_v20 }
 0xe0f   :  { %v483_v23 = vshrl.u32 %v481_v22, 16  ;;  %v482_v24 = vand.u32 65535, %v481_v22 }
 0xe11   :  { %v485_v25 = vcvt.s32.f32 %v483_v23  ;;  %v484_v26 = vcvt.s32.f32 %v482_v24 }
 0xe13   :  { %488 = vadd.xlane.f32.xlu0 %v485_v25  ;;  %486 = vadd.xlane.f32.xlu1 %v484_v26 }
 0xea0   :  { %v489_v27 = vpop.xlane.xlu0 %488  ;;  %v487_v28 = vpop.xlane.xlu1 %486 }
 0xea1   :  { %v491_v29 = vcvt.f32.s32 %v489_v27  ;;  %v490_v31 = vcvt.f32.s32 %v487_v28 }
 0xea3   :  { %v492_v30 = vshll.u32 %v491_v29, 16 }
 0xea5   :  { %v493_v32 = vadd.s32 %v492_v30, %v490_v31 }
 0xea7   :  { %v494_v33 = vrot.slane %v493_v32, 4 }
 0xea9   :  { %v495_v34 = vadd.s32 %v494_v33, %v493_v32 }
 0xeab   :  { %v496_v35 = vrot.slane %v495_v34, 2 }
 0xead   :  { %v497_v36 = vadd.s32 %v496_v35, %v495_v34 }
 0xeaf   :  { %v498_v37 = vrot.slane %v497_v36, 1 }
 0xeb1   :  { %v499_v38 = vadd.s32 %v498_v37, %v497_v36 }
 0xeb3   :  { %951 = vpush %v499_v38 }
 0xee4   :  { %s952_s24 = spop %951 }
 0xee5   :  { %p501_p10 = scmp.ge.s32.totalorder %s952_s24, 204 }
 0xee7   :  { %s1368_s23 = smov (!%p501_p10, %s475_s23), %s1366_s21 }
 0xee8   :  { %s503_s25 = sor.u32 8192, %s1368_s23 }
 0xee9   :  { %v504_v39 = vstv %s503_s25 }
 0xeea   :  { %vm505_vm2 = vcmp.ge.s32.totalorder %v1066_v2, %v504_v39  ;;  %vm506_vm3 = vcmp.ge.s32.totalorder %v1068_v3, %v504_v39 }
 0xeeb   :  { %v507_v40 = vsel %vm505_vm2, 1, %v1039_v4  ;;  %v508_v41 = vsel %vm506_vm3, 1, %v1039_v4 }
 0xeec   :  { %v509_v42 = vadd.s32 %v508_v41, %v507_v40 }
 0xeee   :  { %v511_v43 = vshrl.u32 %v509_v42, 16  ;;  %v510_v44 = vand.u32 65535, %v509_v42 }
 0xef0   :  { %v513_v45 = vcvt.s32.f32 %v511_v43  ;;  %v512_v46 = vcvt.s32.f32 %v510_v44 }
 0xef2   :  { %516 = vadd.xlane.f32.xlu0 %v513_v45  ;;  %514 = vadd.xlane.f32.xlu1 %v512_v46 }
 0xf7f   :  { %v517_v47 = vpop.xlane.xlu0 %516  ;;  %v515_v48 = vpop.xlane.xlu1 %514 }
 0xf80   :  { %v519_v49 = vcvt.f32.s32 %v517_v47  ;;  %v518_v51 = vcvt.f32.s32 %v515_v48 }
 0xf82   :  { %v520_v50 = vshll.u32 %v519_v49, 16 }
 0xf84   :  { %v521_v52 = vadd.s32 %v520_v50, %v518_v51 }
 0xf86   :  { %v522_v53 = vrot.slane %v521_v52, 4 }
 0xf88   :  { %v523_v54 = vadd.s32 %v522_v53, %v521_v52 }
 0xf8a   :  { %v524_v55 = vrot.slane %v523_v54, 2 }
 0xf8c   :  { %v525_v56 = vadd.s32 %v524_v55, %v523_v54 }
 0xf8e   :  { %v526_v57 = vrot.slane %v525_v56, 1 }
 0xf90   :  { %v527_v58 = vadd.s32 %v526_v57, %v525_v56 }
 0xf92   :  { %953 = vpush %v527_v58 }
 0xfc3   :  { %s954_s26 = spop %953 }
 0xfc4   :  { %p529_p11 = scmp.ge.s32.totalorder %s954_s26, 204 }
 0xfc6   :  { %s1370_s25 = smov (!%p529_p11, %s503_s25), %s1368_s23 }
 0xfc7   :  { %s531_s27 = sor.u32 4096, %s1370_s25 }
 0xfc8   :  { %v532_v59 = vstv %s531_s27 }
 0xfc9   :  { %vm533_vm4 = vcmp.ge.s32.totalorder %v1066_v2, %v532_v59  ;;  %vm534_vm5 = vcmp.ge.s32.totalorder %v1068_v3, %v532_v59 }
 0xfca   :  { %v535_v60 = vsel %vm533_vm4, 1, %v1039_v4  ;;  %v536_v61 = vsel %vm534_vm5, 1, %v1039_v4 }
 0xfcb   :  { %v537_v62 = vadd.s32 %v536_v61, %v535_v60 }
 0xfcd   :  { %v539_v63 = vshrl.u32 %v537_v62, 16  ;;  %v538_v0 = vand.u32 65535, %v537_v62 }
 0xfcf   :  { %v541_v1 = vcvt.s32.f32 %v539_v63  ;;  %v540_v5 = vcvt.s32.f32 %v538_v0 }
 0xfd1   :  { %544 = vadd.xlane.f32.xlu0 %v541_v1  ;;  %542 = vadd.xlane.f32.xlu1 %v540_v5 }
0x105e   :  { %v545_v6 = vpop.xlane.xlu0 %544  ;;  %v543_v7 = vpop.xlane.xlu1 %542 }
0x105f   :  { %v547_v8 = vcvt.f32.s32 %v545_v6  ;;  %v546_v10 = vcvt.f32.s32 %v543_v7 }
0x1061   :  { %v548_v9 = vshll.u32 %v547_v8, 16 }
0x1063   :  { %v549_v11 = vadd.s32 %v548_v9, %v546_v10 }
0x1065   :  { %v550_v12 = vrot.slane %v549_v11, 4 }
0x1067   :  { %v551_v13 = vadd.s32 %v550_v12, %v549_v11 }
0x1069   :  { %v552_v14 = vrot.slane %v551_v13, 2 }
0x106b   :  { %v553_v15 = vadd.s32 %v552_v14, %v551_v13 }
0x106d   :  { %v554_v16 = vrot.slane %v553_v15, 1 }
0x106f   :  { %v555_v17 = vadd.s32 %v554_v16, %v553_v15 }
0x1071   :  { %955 = vpush %v555_v17 }
0x10a2   :  { %s956_s28 = spop %955 }
0x10a3   :  { %p557_p12 = scmp.ge.s32.totalorder %s956_s28, 204 }
0x10a5   :  { %s1372_s27 = smov (!%p557_p12, %s531_s27), %s1370_s25  ;;  %s1040_s25 = smov [#allocation5]  }
0x10a6   :  { %s559_s29 = sor.u32 2048, %s1372_s27  ;;  %s907_s26 = sshll.u32 %s1040_s25, 4  ;;  %s908_s26 = int_to_ptr.vmem [resolvable:$true] %s907_s26 }
0x10a7   :  { %v560_v18 = vstv %s559_s29  ;;  %p1015_p12 = scmp.lt.s32.totalorder %s908_s26, %s908_s26 }
0x10a8   :  { %vm561_vm6 = vcmp.ge.s32.totalorder %v1066_v2, %v560_v18  ;;  %vm562_vm7 = vcmp.ge.s32.totalorder %v1068_v3, %v560_v18 }
0x10a9   :  { %v563_v19 = vsel %vm561_vm6, 1, %v1039_v4  ;;  %v564_v20 = vsel %vm562_vm7, 1, %v1039_v4 }
0x10aa   :  { %v565_v21 = vadd.s32 %v564_v20, %v563_v19 }
0x10ac   :  { %v567_v22 = vshrl.u32 %v565_v21, 16  ;;  %v566_v23 = vand.u32 65535, %v565_v21 }
0x10ae   :  { %v569_v24 = vcvt.s32.f32 %v567_v22  ;;  %v568_v25 = vcvt.s32.f32 %v566_v23 }
0x10b0   :  { %572 = vadd.xlane.f32.xlu0 %v569_v24  ;;  %570 = vadd.xlane.f32.xlu1 %v568_v25 }
0x113d   :  { %v573_v26 = vpop.xlane.xlu0 %572  ;;  %v571_v27 = vpop.xlane.xlu1 %570 }
0x113e   :  { %v575_v28 = vcvt.f32.s32 %v573_v26  ;;  %v574_v30 = vcvt.f32.s32 %v571_v27 }
0x1140   :  { %v576_v29 = vshll.u32 %v575_v28, 16 }
0x1142   :  { %v577_v31 = vadd.s32 %v576_v29, %v574_v30 }
0x1144   :  { %v578_v32 = vrot.slane %v577_v31, 4 }
0x1146   :  { %v579_v33 = vadd.s32 %v578_v32, %v577_v31 }
0x1148   :  { %v580_v34 = vrot.slane %v579_v33, 2 }
0x114a   :  { %v581_v35 = vadd.s32 %v580_v34, %v579_v33 }
0x114c   :  { %v582_v36 = vrot.slane %v581_v35, 1 }
0x114e   :  { %v583_v37 = vadd.s32 %v582_v36, %v581_v35 }
0x1150   :  { %957 = vpush %v583_v37 }
0x1181   :  { %s958_s30 = spop %957 }
0x1182   :  { %p585_p13 = scmp.ge.s32.totalorder %s958_s30, 204 }
0x1184   :  { %s1374_s29 = smov (!%p585_p13, %s559_s29), %s1372_s27  ;;  %s1010_s27 = scalar_lea.vmem %s908_s26, 256 }
0x1185   :  { %s587_s2 = sor.u32 1024, %s1374_s29  ;;  %p1011_p11 = scmp.ne.s32.totalorder %s908_s26, %s1010_s27 }
0x1186   :  { %v588_v38 = vstv %s587_s2  ;;  %p1016_p13 = scmp.lt.s32.totalorder %s1010_s27, %s1010_s27 }
0x1187   :  { %vm589_vm8 = vcmp.ge.s32.totalorder %v1066_v2, %v588_v38  ;;  %vm590_vm9 = vcmp.ge.s32.totalorder %v1068_v3, %v588_v38 }
0x1188   :  { %v591_v39 = vsel %vm589_vm8, 1, %v1039_v4  ;;  %v592_v40 = vsel %vm590_vm9, 1, %v1039_v4 }
0x1189   :  { %v593_v41 = vadd.s32 %v592_v40, %v591_v39 }
0x118b   :  { %v595_v42 = vshrl.u32 %v593_v41, 16  ;;  %v594_v43 = vand.u32 65535, %v593_v41 }
0x118d   :  { %v597_v44 = vcvt.s32.f32 %v595_v42  ;;  %v596_v45 = vcvt.s32.f32 %v594_v43 }
0x118f   :  { %600 = vadd.xlane.f32.xlu0 %v597_v44  ;;  %598 = vadd.xlane.f32.xlu1 %v596_v45 }
0x121c   :  { %v601_v46 = vpop.xlane.xlu0 %600  ;;  %v599_v47 = vpop.xlane.xlu1 %598 }
0x121d   :  { %v603_v48 = vcvt.f32.s32 %v601_v46  ;;  %v602_v50 = vcvt.f32.s32 %v599_v47 }
0x121f   :  { %v604_v49 = vshll.u32 %v603_v48, 16 }
0x1221   :  { %v605_v51 = vadd.s32 %v604_v49, %v602_v50 }
0x1223   :  { %v606_v52 = vrot.slane %v605_v51, 4 }
0x1225   :  { %v607_v53 = vadd.s32 %v606_v52, %v605_v51 }
0x1227   :  { %v608_v54 = vrot.slane %v607_v53, 2 }
0x1229   :  { %v609_v55 = vadd.s32 %v608_v54, %v607_v53 }
0x122b   :  { %v610_v56 = vrot.slane %v609_v55, 1 }
0x122d   :  { %v611_v57 = vadd.s32 %v610_v56, %v609_v55 }
0x122f   :  { %959 = vpush %v611_v57 }
0x1260   :  { %s960_s3 = spop %959 }
0x1261   :  { %p613_p0 = scmp.ge.s32.totalorder %s960_s3, 204 }
0x1263   :  { %s1376_s2 = smov (!%p613_p0, %s587_s2), %s1374_s29  ;;  %p1017_p0 = por %p1016_p13, %p1015_p12 }
0x1264   :  { %s615_s4 = sor.u32 512, %s1376_s2 }
0x1265   :  { %v616_v58 = vstv %s615_s4 }
0x1266   :  { %vm617_vm10 = vcmp.ge.s32.totalorder %v1066_v2, %v616_v58  ;;  %vm618_vm11 = vcmp.ge.s32.totalorder %v1068_v3, %v616_v58 }
0x1267   :  { %v619_v59 = vsel %vm617_vm10, 1, %v1039_v4  ;;  %v620_v60 = vsel %vm618_vm11, 1, %v1039_v4 }
0x1268   :  { %v621_v61 = vadd.s32 %v620_v60, %v619_v59 }
0x126a   :  { %v623_v62 = vshrl.u32 %v621_v61, 16  ;;  %v622_v63 = vand.u32 65535, %v621_v61 }
0x126c   :  { %v625_v0 = vcvt.s32.f32 %v623_v62  ;;  %v624_v1 = vcvt.s32.f32 %v622_v63 }
0x126e   :  { %628 = vadd.xlane.f32.xlu0 %v625_v0  ;;  %626 = vadd.xlane.f32.xlu1 %v624_v1 }
0x12fb   :  { %v629_v5 = vpop.xlane.xlu0 %628  ;;  %v627_v6 = vpop.xlane.xlu1 %626 }
0x12fc   :  { %v631_v7 = vcvt.f32.s32 %v629_v5  ;;  %v630_v9 = vcvt.f32.s32 %v627_v6 }
0x12fe   :  { %v632_v8 = vshll.u32 %v631_v7, 16 }
0x1300   :  { %v633_v10 = vadd.s32 %v632_v8, %v630_v9 }
0x1302   :  { %v634_v11 = vrot.slane %v633_v10, 4 }
0x1304   :  { %v635_v12 = vadd.s32 %v634_v11, %v633_v10 }
0x1306   :  { %v636_v13 = vrot.slane %v635_v12, 2 }
0x1308   :  { %v637_v14 = vadd.s32 %v636_v13, %v635_v12 }
0x130a   :  { %v638_v15 = vrot.slane %v637_v14, 1 }
0x130c   :  { %v639_v16 = vadd.s32 %v638_v15, %v637_v14 }
0x130e   :  { %961 = vpush %v639_v16 }
0x133f   :  { %s962_s5 = spop %961 }
0x1340   :  { %p641_p1 = scmp.ge.s32.totalorder %s962_s5, 204 }
0x1342   :  { %s1378_s4 = smov (!%p641_p1, %s615_s4), %s1376_s2  ;;  %p1018_p1 = pnand %p1017_p0, %p1011_p11 }
0x1343   :  { %s643_s6 = sor.u32 256, %s1378_s4 }
0x1344   :  { %v644_v17 = vstv %s643_s6 }
0x1345   :  { %vm645_vm12 = vcmp.ge.s32.totalorder %v1066_v2, %v644_v17  ;;  %vm646_vm13 = vcmp.ge.s32.totalorder %v1068_v3, %v644_v17 }
0x1346   :  { %v647_v18 = vsel %vm645_vm12, 1, %v1039_v4  ;;  %v648_v19 = vsel %vm646_vm13, 1, %v1039_v4 }
0x1347   :  { %v649_v20 = vadd.s32 %v648_v19, %v647_v18 }
0x1349   :  { %v651_v21 = vshrl.u32 %v649_v20, 16  ;;  %v650_v22 = vand.u32 65535, %v649_v20 }
0x134b   :  { %v653_v23 = vcvt.s32.f32 %v651_v21  ;;  %v652_v24 = vcvt.s32.f32 %v650_v22 }
0x134d   :  { %656 = vadd.xlane.f32.xlu0 %v653_v23  ;;  %654 = vadd.xlane.f32.xlu1 %v652_v24 }
0x13da   :  { %v657_v25 = vpop.xlane.xlu0 %656  ;;  %v655_v26 = vpop.xlane.xlu1 %654 }
0x13db   :  { %v659_v27 = vcvt.f32.s32 %v657_v25  ;;  %v658_v29 = vcvt.f32.s32 %v655_v26 }
0x13dd   :  { %v660_v28 = vshll.u32 %v659_v27, 16 }
0x13df   :  { %v661_v30 = vadd.s32 %v660_v28, %v658_v29 }
0x13e1   :  { %v662_v31 = vrot.slane %v661_v30, 4 }
0x13e3   :  { %v663_v32 = vadd.s32 %v662_v31, %v661_v30 }
0x13e5   :  { %v664_v33 = vrot.slane %v663_v32, 2 }
0x13e7   :  { %v665_v34 = vadd.s32 %v664_v33, %v663_v32 }
0x13e9   :  { %v666_v35 = vrot.slane %v665_v34, 1 }
0x13eb   :  { %v667_v36 = vadd.s32 %v666_v35, %v665_v34 }
0x13ed   :  { %963 = vpush %v667_v36 }
0x141e   :  { %s964_s7 = spop %963 }
0x141f   :  { %p669_p2 = scmp.ge.s32.totalorder %s964_s7, 204 }
0x1421   :  { %s1380_s6 = smov (!%p669_p2, %s643_s6), %s1378_s4 }
0x1422   :  { %s671_s8 = sor.u32 128, %s1380_s6 }
0x1423   :  { %v672_v37 = vstv %s671_s8 }
0x1424   :  { %vm673_vm14 = vcmp.ge.s32.totalorder %v1066_v2, %v672_v37  ;;  %vm674_vm15 = vcmp.ge.s32.totalorder %v1068_v3, %v672_v37 }
0x1425   :  { %v675_v38 = vsel %vm673_vm14, 1, %v1039_v4  ;;  %v676_v39 = vsel %vm674_vm15, 1, %v1039_v4 }
0x1426   :  { %v677_v40 = vadd.s32 %v676_v39, %v675_v38 }
0x1428   :  { %v679_v41 = vshrl.u32 %v677_v40, 16  ;;  %v678_v42 = vand.u32 65535, %v677_v40 }
0x142a   :  { %v681_v43 = vcvt.s32.f32 %v679_v41  ;;  %v680_v44 = vcvt.s32.f32 %v678_v42 }
0x142c   :  { %684 = vadd.xlane.f32.xlu0 %v681_v43  ;;  %682 = vadd.xlane.f32.xlu1 %v680_v44 }
0x14b9   :  { %v685_v45 = vpop.xlane.xlu0 %684  ;;  %v683_v46 = vpop.xlane.xlu1 %682 }
0x14ba   :  { %v687_v47 = vcvt.f32.s32 %v685_v45  ;;  %v686_v49 = vcvt.f32.s32 %v683_v46 }
0x14bc   :  { %v688_v48 = vshll.u32 %v687_v47, 16 }
0x14be   :  { %v689_v50 = vadd.s32 %v688_v48, %v686_v49 }
0x14c0   :  { %v690_v51 = vrot.slane %v689_v50, 4 }
0x14c2   :  { %v691_v52 = vadd.s32 %v690_v51, %v689_v50 }
0x14c4   :  { %v692_v53 = vrot.slane %v691_v52, 2 }
0x14c6   :  { %v693_v54 = vadd.s32 %v692_v53, %v691_v52 }
0x14c8   :  { %v694_v55 = vrot.slane %v693_v54, 1 }
0x14ca   :  { %v695_v56 = vadd.s32 %v694_v55, %v693_v54 }
0x14cc   :  { %965 = vpush %v695_v56 }
0x14fd   :  { %s966_s9 = spop %965 }
0x14fe   :  { %p697_p3 = scmp.ge.s32.totalorder %s966_s9, 204 }
0x1500   :  { %s1382_s8 = smov (!%p697_p3, %s671_s8), %s1380_s6 }
0x1501   :  { %s699_s10 = sor.u32 64, %s1382_s8 }
0x1502   :  { %v700_v57 = vstv %s699_s10 }
0x1503   :  { %vm701_vm0 = vcmp.ge.s32.totalorder %v1066_v2, %v700_v57  ;;  %vm702_vm1 = vcmp.ge.s32.totalorder %v1068_v3, %v700_v57 }
0x1504   :  { %v703_v58 = vsel %vm701_vm0, 1, %v1039_v4  ;;  %v704_v59 = vsel %vm702_vm1, 1, %v1039_v4 }
0x1505   :  { %v705_v60 = vadd.s32 %v704_v59, %v703_v58 }
0x1507   :  { %v707_v61 = vshrl.u32 %v705_v60, 16  ;;  %v706_v62 = vand.u32 65535, %v705_v60 }
0x1509   :  { %v709_v63 = vcvt.s32.f32 %v707_v61  ;;  %v708_v0 = vcvt.s32.f32 %v706_v62 }
0x150b   :  { %712 = vadd.xlane.f32.xlu0 %v709_v63  ;;  %710 = vadd.xlane.f32.xlu1 %v708_v0 }
0x1598   :  { %v713_v1 = vpop.xlane.xlu0 %712  ;;  %v711_v5 = vpop.xlane.xlu1 %710 }
0x1599   :  { %v715_v6 = vcvt.f32.s32 %v713_v1  ;;  %v714_v8 = vcvt.f32.s32 %v711_v5 }
0x159b   :  { %v716_v7 = vshll.u32 %v715_v6, 16 }
0x159d   :  { %v717_v9 = vadd.s32 %v716_v7, %v714_v8 }
0x159f   :  { %v718_v10 = vrot.slane %v717_v9, 4 }
0x15a1   :  { %v719_v11 = vadd.s32 %v718_v10, %v717_v9 }
0x15a3   :  { %v720_v12 = vrot.slane %v719_v11, 2 }
0x15a5   :  { %v721_v13 = vadd.s32 %v720_v12, %v719_v11 }
0x15a7   :  { %v722_v14 = vrot.slane %v721_v13, 1 }
0x15a9   :  { %v723_v15 = vadd.s32 %v722_v14, %v721_v13 }
0x15ab   :  { %967 = vpush %v723_v15 }
0x15dc   :  { %s968_s11 = spop %967 }
0x15dd   :  { %p725_p4 = scmp.ge.s32.totalorder %s968_s11, 204 }
0x15df   :  { %s1384_s10 = smov (!%p725_p4, %s699_s10), %s1382_s8 }
0x15e0   :  { %s727_s12 = sor.u32 32, %s1384_s10 }
0x15e1   :  { %v728_v16 = vstv %s727_s12 }
0x15e2   :  { %vm729_vm2 = vcmp.ge.s32.totalorder %v1066_v2, %v728_v16  ;;  %vm730_vm3 = vcmp.ge.s32.totalorder %v1068_v3, %v728_v16 }
0x15e3   :  { %v731_v17 = vsel %vm729_vm2, 1, %v1039_v4  ;;  %v732_v18 = vsel %vm730_vm3, 1, %v1039_v4 }
0x15e4   :  { %v733_v19 = vadd.s32 %v732_v18, %v731_v17 }
0x15e6   :  { %v735_v20 = vshrl.u32 %v733_v19, 16  ;;  %v734_v21 = vand.u32 65535, %v733_v19 }
0x15e8   :  { %v737_v22 = vcvt.s32.f32 %v735_v20  ;;  %v736_v23 = vcvt.s32.f32 %v734_v21 }
0x15ea   :  { %740 = vadd.xlane.f32.xlu0 %v737_v22  ;;  %738 = vadd.xlane.f32.xlu1 %v736_v23 }
0x1677   :  { %v741_v24 = vpop.xlane.xlu0 %740  ;;  %v739_v25 = vpop.xlane.xlu1 %738 }
0x1678   :  { %v743_v26 = vcvt.f32.s32 %v741_v24  ;;  %v742_v28 = vcvt.f32.s32 %v739_v25 }
0x167a   :  { %v744_v27 = vshll.u32 %v743_v26, 16 }
0x167c   :  { %v745_v29 = vadd.s32 %v744_v27, %v742_v28 }
0x167e   :  { %v746_v30 = vrot.slane %v745_v29, 4 }
0x1680   :  { %v747_v31 = vadd.s32 %v746_v30, %v745_v29 }
0x1682   :  { %v748_v32 = vrot.slane %v747_v31, 2 }
0x1684   :  { %v749_v33 = vadd.s32 %v748_v32, %v747_v31 }
0x1686   :  { %v750_v34 = vrot.slane %v749_v33, 1 }
0x1688   :  { %v751_v35 = vadd.s32 %v750_v34, %v749_v33 }
0x168a   :  { %969 = vpush %v751_v35 }
0x16bb   :  { %s970_s13 = spop %969 }
0x16bc   :  { %p753_p5 = scmp.ge.s32.totalorder %s970_s13, 204 }
0x16be   :  { %s1386_s12 = smov (!%p753_p5, %s727_s12), %s1384_s10 }
0x16bf   :  { %s755_s14 = sor.u32 16, %s1386_s12 }
0x16c0   :  { %v756_v36 = vstv %s755_s14 }
0x16c1   :  { %vm757_vm4 = vcmp.ge.s32.totalorder %v1066_v2, %v756_v36  ;;  %vm758_vm5 = vcmp.ge.s32.totalorder %v1068_v3, %v756_v36 }
0x16c2   :  { %v759_v37 = vsel %vm757_vm4, 1, %v1039_v4  ;;  %v760_v38 = vsel %vm758_vm5, 1, %v1039_v4 }
0x16c3   :  { %v761_v39 = vadd.s32 %v760_v38, %v759_v37 }
0x16c5   :  { %v763_v40 = vshrl.u32 %v761_v39, 16  ;;  %v762_v41 = vand.u32 65535, %v761_v39 }
0x16c7   :  { %v765_v42 = vcvt.s32.f32 %v763_v40  ;;  %v764_v43 = vcvt.s32.f32 %v762_v41 }
0x16c9   :  { %768 = vadd.xlane.f32.xlu0 %v765_v42  ;;  %766 = vadd.xlane.f32.xlu1 %v764_v43 }
0x1756   :  { %v769_v44 = vpop.xlane.xlu0 %768  ;;  %v767_v45 = vpop.xlane.xlu1 %766 }
0x1757   :  { %v771_v46 = vcvt.f32.s32 %v769_v44  ;;  %v770_v48 = vcvt.f32.s32 %v767_v45 }
0x1759   :  { %v772_v47 = vshll.u32 %v771_v46, 16 }
0x175b   :  { %v773_v49 = vadd.s32 %v772_v47, %v770_v48 }
0x175d   :  { %v774_v50 = vrot.slane %v773_v49, 4 }
0x175f   :  { %v775_v51 = vadd.s32 %v774_v50, %v773_v49 }
0x1761   :  { %v776_v52 = vrot.slane %v775_v51, 2 }
0x1763   :  { %v777_v53 = vadd.s32 %v776_v52, %v775_v51 }
0x1765   :  { %v778_v54 = vrot.slane %v777_v53, 1 }
0x1767   :  { %v779_v55 = vadd.s32 %v778_v54, %v777_v53 }
0x1769   :  { %971 = vpush %v779_v55 }
0x179a   :  { %s972_s15 = spop %971 }
0x179b   :  { %p781_p6 = scmp.ge.s32.totalorder %s972_s15, 204 }
0x179d   :  { %s1388_s14 = smov (!%p781_p6, %s755_s14), %s1386_s12 }
0x179e   :  { %s783_s18 = sor.u32 8, %s1388_s14 }
0x179f   :  { %v784_v56 = vstv %s783_s18 }
0x17a0   :  { %vm785_vm6 = vcmp.ge.s32.totalorder %v1066_v2, %v784_v56  ;;  %vm786_vm7 = vcmp.ge.s32.totalorder %v1068_v3, %v784_v56 }
0x17a1   :  { %v787_v57 = vsel %vm785_vm6, 1, %v1039_v4  ;;  %v788_v58 = vsel %vm786_vm7, 1, %v1039_v4 }
0x17a2   :  { %v789_v59 = vadd.s32 %v788_v58, %v787_v57 }
0x17a4   :  { %v791_v60 = vshrl.u32 %v789_v59, 16  ;;  %v790_v61 = vand.u32 65535, %v789_v59 }
0x17a6   :  { %v793_v62 = vcvt.s32.f32 %v791_v60  ;;  %v792_v63 = vcvt.s32.f32 %v790_v61 }
0x17a8   :  { %796 = vadd.xlane.f32.xlu0 %v793_v62  ;;  %794 = vadd.xlane.f32.xlu1 %v792_v63 }
0x1835   :  { %v797_v0 = vpop.xlane.xlu0 %796  ;;  %v795_v1 = vpop.xlane.xlu1 %794 }
0x1836   :  { %v799_v5 = vcvt.f32.s32 %v797_v0  ;;  %v798_v7 = vcvt.f32.s32 %v795_v1 }
0x1838   :  { %v800_v6 = vshll.u32 %v799_v5, 16 }
0x183a   :  { %v801_v8 = vadd.s32 %v800_v6, %v798_v7 }
0x183c   :  { %v802_v9 = vrot.slane %v801_v8, 4 }
0x183e   :  { %v803_v10 = vadd.s32 %v802_v9, %v801_v8 }
0x1840   :  { %v804_v11 = vrot.slane %v803_v10, 2 }
0x1842   :  { %v805_v12 = vadd.s32 %v804_v11, %v803_v10 }
0x1844   :  { %v806_v13 = vrot.slane %v805_v12, 1 }
0x1846   :  { %v807_v14 = vadd.s32 %v806_v13, %v805_v12 }
0x1848   :  { %973 = vpush %v807_v14  ;;  %v986_v14 = vld [vmem:[#allocation2] sm:$0xff] }
0x1879   :  { %s974_s19 = spop %973 }
0x187a   :  { %p809_p7 = scmp.ge.s32.totalorder %s974_s19, 204 }
0x187c   :  { %s1390_s18 = smov (!%p809_p7, %s783_s18), %s1388_s14 }
0x187d   :  { %s811_s0 = sor.u32 4, %s1390_s18 }
0x187e   :  { %v812_v15 = vstv %s811_s0 }
0x187f   :  { %vm813_vm8 = vcmp.ge.s32.totalorder %v1066_v2, %v812_v15  ;;  %vm814_vm9 = vcmp.ge.s32.totalorder %v1068_v3, %v812_v15 }
0x1880   :  { %v815_v16 = vsel %vm813_vm8, 1, %v1039_v4  ;;  %v816_v17 = vsel %vm814_vm9, 1, %v1039_v4 }
0x1881   :  { %v817_v18 = vadd.s32 %v816_v17, %v815_v16  ;;  %v987_v16 = vld [vmem:[#allocation2 + $0x8] sm:$0xff] }
0x1883   :  { %v819_v19 = vshrl.u32 %v817_v18, 16  ;;  %v818_v20 = vand.u32 65535, %v817_v18 }
0x1885   :  { %v821_v21 = vcvt.s32.f32 %v819_v19  ;;  %v820_v22 = vcvt.s32.f32 %v818_v20 }
0x1887   :  { %824 = vadd.xlane.f32.xlu0 %v821_v21  ;;  %822 = vadd.xlane.f32.xlu1 %v820_v22 }
0x1914   :  { %v825_v23 = vpop.xlane.xlu0 %824  ;;  %v823_v24 = vpop.xlane.xlu1 %822 }
0x1915   :  { %v827_v25 = vcvt.f32.s32 %v825_v23  ;;  %v826_v27 = vcvt.f32.s32 %v823_v24 }
0x1917   :  { %v828_v26 = vshll.u32 %v827_v25, 16 }
0x1919   :  { %v829_v28 = vadd.s32 %v828_v26, %v826_v27 }
0x191b   :  { %v830_v29 = vrot.slane %v829_v28, 4 }
0x191d   :  { %v831_v30 = vadd.s32 %v830_v29, %v829_v28 }
0x191f   :  { %v832_v31 = vrot.slane %v831_v30, 2 }
0x1921   :  { %v833_v32 = vadd.s32 %v832_v31, %v831_v30 }
0x1923   :  { %v834_v33 = vrot.slane %v833_v32, 1 }
0x1925   :  { %v835_v34 = vadd.s32 %v834_v33, %v833_v32 }
0x1927   :  { %975 = vpush %v835_v34 }
0x1958   :  { %s976_s20 = spop %975 }
0x1959   :  { %p837_p8 = scmp.ge.s32.totalorder %s976_s20, 204 }
0x195b   :  { %s1392_s0 = smov (!%p837_p8, %s811_s0), %s1390_s18 }
0x195c   :  { %s839_s21 = sor.u32 2, %s1392_s0 }
0x195d   :  { %v840_v35 = vstv %s839_s21 }
0x195e   :  { %vm841_vm10 = vcmp.ge.s32.totalorder %v1066_v2, %v840_v35  ;;  %vm842_vm11 = vcmp.ge.s32.totalorder %v1068_v3, %v840_v35 }
0x195f   :  { %v843_v36 = vsel %vm841_vm10, 1, %v1039_v4  ;;  %v844_v37 = vsel %vm842_vm11, 1, %v1039_v4 }
0x1960   :  { %v845_v38 = vadd.s32 %v844_v37, %v843_v36 }
0x1962   :  { %v847_v39 = vshrl.u32 %v845_v38, 16  ;;  %v846_v40 = vand.u32 65535, %v845_v38 }
0x1964   :  { %v849_v41 = vcvt.s32.f32 %v847_v39  ;;  %v848_v42 = vcvt.s32.f32 %v846_v40 }
0x1966   :  { %852 = vadd.xlane.f32.xlu0 %v849_v41  ;;  %850 = vadd.xlane.f32.xlu1 %v848_v42 }
0x19f3   :  { %v853_v43 = vpop.xlane.xlu0 %852  ;;  %v851_v44 = vpop.xlane.xlu1 %850 }
0x19f4   :  { %v855_v45 = vcvt.f32.s32 %v853_v43  ;;  %v854_v47 = vcvt.f32.s32 %v851_v44 }
0x19f6   :  { %v856_v46 = vshll.u32 %v855_v45, 16 }
0x19f8   :  { %v857_v48 = vadd.s32 %v856_v46, %v854_v47 }
0x19fa   :  { %v858_v49 = vrot.slane %v857_v48, 4 }
0x19fc   :  { %v859_v50 = vadd.s32 %v858_v49, %v857_v48 }
0x19fe   :  { %v860_v51 = vrot.slane %v859_v50, 2 }
0x1a00   :  { %v861_v52 = vadd.s32 %v860_v51, %v859_v50 }
0x1a02   :  { %v862_v53 = vrot.slane %v861_v52, 1 }
0x1a04   :  { %v863_v54 = vadd.s32 %v862_v53, %v861_v52 }
0x1a06   :  { %977 = vpush %v863_v54 }
0x1a37   :  { %s978_s22 = spop %977 }
0x1a38   :  { %p865_p9 = scmp.ge.s32.totalorder %s978_s22, 204 }
0x1a3a   :  { %s1394_s21 = smov (!%p865_p9, %s839_s21), %s1392_s0 }
0x1a3b   :  { %s867_s23 = sor.u32 1, %s1394_s21 }
0x1a3c   :  { %v868_v55 = vstv %s867_s23 }
0x1a3d   :  { %vm869_vm12 = vcmp.ge.s32.totalorder %v1066_v2, %v868_v55  ;;  %vm870_vm13 = vcmp.ge.s32.totalorder %v1068_v3, %v868_v55 }
0x1a3e   :  { %v871_v56 = vsel %vm869_vm12, 1, %v1039_v4  ;;  %v872_v57 = vsel %vm870_vm13, 1, %v1039_v4 }
0x1a3f   :  { %v873_v58 = vadd.s32 %v872_v57, %v871_v56 }
0x1a41   :  { %v875_v59 = vshrl.u32 %v873_v58, 16  ;;  %v874_v60 = vand.u32 65535, %v873_v58 }
0x1a43   :  { %v877_v61 = vcvt.s32.f32 %v875_v59  ;;  %v876_v62 = vcvt.s32.f32 %v874_v60 }
0x1a45   :  { %880 = vadd.xlane.f32.xlu0 %v877_v61  ;;  %878 = vadd.xlane.f32.xlu1 %v876_v62 }
0x1ad2   :  { %v881_v63 = vpop.xlane.xlu0 %880  ;;  %v879_v0 = vpop.xlane.xlu1 %878 }
0x1ad3   :  { %v883_v1 = vcvt.f32.s32 %v881_v63  ;;  %v882_v6 = vcvt.f32.s32 %v879_v0 }
0x1ad5   :  { %v884_v5 = vshll.u32 %v883_v1, 16 }
0x1ad7   :  { %v885_v7 = vadd.s32 %v884_v5, %v882_v6 }
0x1ad9   :  { %v886_v8 = vrot.slane %v885_v7, 4 }
0x1adb   :  { %v887_v9 = vadd.s32 %v886_v8, %v885_v7 }
0x1add   :  { %v888_v10 = vrot.slane %v887_v9, 2 }
0x1adf   :  { %v889_v11 = vadd.s32 %v888_v10, %v887_v9 }
0x1ae1   :  { %v890_v4 = vrot.slane %v889_v11, 1 }
0x1ae3   :  { %v891_v12 = vadd.s32 %v890_v4, %v889_v11 }
0x1ae5   :  { %979 = vpush %v891_v12 }
0x1b16   :  { %s980_s24 = spop %979 }
0x1b17   :  { %p893_p10 = scmp.ge.s32.totalorder %s980_s24, 204 }
0x1b19   :  { %s1396_s23 = smov (!%p893_p10, %s867_s23), %s1394_s21 }
0x1b1a   :  { %v895_v13 = vstv %s1396_s23 }
0x1b1b   :  { %vm896_vm14 = vcmp.ge.s32.totalorder %v1066_v2, %v895_v13  ;;  %vm897_vm15 = vcmp.ge.s32.totalorder %v1068_v3, %v895_v13 }
0x1b1c   :  { %v898_v15 = vsel %vm896_vm14, %v986_v14, 0.0  ;;  %v899_v17 = vsel %vm897_vm15, %v987_v16, 0.0 }
0x1b1d   :  { %900 = vst [vmem:[#allocation5] sm:$0xff] %v898_v15  ;;  %901 = vst [vmem:[#allocation5 + $0x8] sm:$0xff] %v899_v17 }
0x1b1e   :  { %1021 = shalt.err (!%p1018_p1)
}
0x1b1f   :  { %s1022_s30 = scalar_lea.hbm %s1336_s1, 256 }
0x1b20   :  { %p1023_p2 = scmp.ne.s32.totalorder %s1336_s1, %s1022_s30  ;;  %p1026_p3 = scmp.lt.u32.totalorder %s1022_s30, %s1336_s1 }
0x1b22   :  { %p1028_p4 = pnand %p1026_p3, %p1023_p2 }
0x1b24   :  { %1031 = shalt.err (!%p1028_p4)
}
0x1b25   :  { %913 = dma.vmem_to_hbm [thread:$0]  %s908_s26, 256, %s1336_s1, [#allocation4], %s1037_s16, %s1037_s16, %s1038_s17  }
0x1b26   :  { %1034 = dma.done.wait [#allocation4], 256  }
0x1b27   :  { %1035 = vsyncadd [#allocation4], 4294967040 }
0x1b28   :  { %917 = vsyncpa [#allocation3], 1 }
0x1b29   :  { %918 = vsyncpa [#allocation4], 1 }

</bundles_post_ra>
